<compile_context>
chip_gen: v7x
topology: tpu7x:2x2x1
jax: 0.10.0
libtpu: 0.0.40
codegen_flags: <defaults>
</compile_context>

<pallas_src>
import functools

import jax
import jax.numpy as jnp
import numpy as np
from jax.experimental import pallas as pl
from jax.experimental.pallas import tpu as pltpu

# Matmul tile caps (bf16 operands).  bm/bn/bk = 512/512/1024 keeps the
# double-buffered working set ~6-8 MiB: inside the VMEM budget on every
# generation (v5e/v6e 128 MiB physical, v7x 64 MiB per TensorCore) once the
# scoped limit below is raised past the v5e 16 MiB default.
BM_CAP, BN_CAP, BK_CAP = 512, 512, 1024
VMEM_LIMIT = 64 * 1024 * 1024


def _round_up(x, m):
    return ((x + m - 1) // m) * m


def _pick_block(size, cap, unit):
    """Largest block <= cap (multiple of `unit`) minimizing padding of `size`."""
    size_r = _round_up(size, unit)
    if size_r <= cap:
        return size_r
    best_b, best_pad = unit, None
    b = (cap // unit) * unit
    while b >= unit:
        pad = _round_up(size_r, b) - size_r
        if best_pad is None or pad < best_pad:
            best_b, best_pad = b, pad
            if pad == 0:
                break
        b -= unit
    return best_b


def _pad2(a, rows, cols, dtype):
    a = a.astype(dtype)
    r, c = a.shape
    if (r, c) == (rows, cols):
        return a
    return jnp.pad(a, ((0, rows - r), (0, cols - c)))


def _swish(y):
    # Minimal-op swish: y / (1 + exp(-y)).  For very negative y, exp(-y)->inf
    # and y/inf -> 0, so no abs/compare/where stabilization is needed (keeps the
    # VALU-bound depthwise kernel lean).  Division is exact, so no approx-recip
    # error compounds across the 16 MBConv blocks.
    return y / (1.0 + jnp.exp(-y))


# ----------------------------------------------------------------------------
# Pallas kernel 1: fused matmul  out = act(x @ w + bias [+ residual])
#   bf16 operands, f32 accumulation, BN scale pre-folded into w by the wrapper.
# ----------------------------------------------------------------------------
def _epilogue(acc, b_ref, r_ref, act):
    y = acc + b_ref[...]
    if r_ref is not None:
        y = y + r_ref[...].astype(jnp.float32)
    if act == "relu":
        y = jnp.maximum(y, 0.0)
    elif act == "swish":
        y = _swish(y)
    return y


def _mm_kernel_single_k(x_ref, w_ref, b_ref, *rest, act, has_res):
    if has_res:
        r_ref, o_ref = rest
    else:
        (o_ref,) = rest
        r_ref = None
    acc = jnp.dot(x_ref[...], w_ref[...], preferred_element_type=jnp.float32)
    o_ref[...] = _epilogue(acc, b_ref, r_ref, act).astype(o_ref.dtype)


def _mm_kernel_multi_k(x_ref, w_ref, b_ref, *rest, act, has_res):
    if has_res:
        r_ref, o_ref, acc_ref = rest
    else:
        o_ref, acc_ref = rest
        r_ref = None
    k = pl.program_id(2)

    @pl.when(k == 0)
    def _():
        acc_ref[...] = jnp.zeros_like(acc_ref)

    acc_ref[...] += jnp.dot(x_ref[...], w_ref[...],
                            preferred_element_type=jnp.float32)

    @pl.when(k == pl.num_programs(2) - 1)
    def _():
        o_ref[...] = _epilogue(acc_ref[...], b_ref, r_ref, act).astype(o_ref.dtype)


@functools.partial(jax.jit, static_argnames=("act", "out_dtype"))
def _fused_matmul(x, w, bias, residual, act, out_dtype):
    """x:(M,K) w:(K,N) bias:(N,) residual:(M,N)|None -> (M,N) in out_dtype."""
    M, K = x.shape
    N = w.shape[1]
    bm = _pick_block(M, BM_CAP, 16)     # 16-row tiles: native bf16 sublane pack
    bn = _pick_block(N, BN_CAP, 128)
    bk = _pick_block(K, BK_CAP, 128)
    Mp, Np, Kp = _round_up(M, bm), _round_up(N, bn), _round_up(K, bk)

    xp = _pad2(x, Mp, Kp, jnp.bfloat16)            # bf16 operands -> MXU rate
    wp = _pad2(w, Kp, Np, jnp.bfloat16)            # BN scale already folded in
    bp = _pad2(bias.reshape(1, N), 1, Np, jnp.float32)

    has_res = residual is not None
    nk = Kp // bk

    cost = pl.CostEstimate(
        flops=2 * Mp * Np * Kp,
        transcendentals=Mp * Np if act == "swish" else 0,
        bytes_accessed=(Mp * Kp * 2 + Kp * Np * 2
                        + Mp * Np * np.dtype(out_dtype).itemsize
                        + (Mp * Np * 2 if has_res else 0)))

    if nk > 1:
        kernel = functools.partial(_mm_kernel_multi_k, act=act, has_res=has_res)
        grid = (Mp // bm, Np // bn, nk)
        in_specs = [
            pl.BlockSpec((bm, bk), lambda i, j, k: (i, k)),
            pl.BlockSpec((bk, bn), lambda i, j, k: (k, j)),
            pl.BlockSpec((1, bn), lambda i, j, k: (0, j)),
        ]
        res_spec = pl.BlockSpec((bm, bn), lambda i, j, k: (i, j))
        out_spec = pl.BlockSpec((bm, bn), lambda i, j, k: (i, j))
        scratch = [pltpu.VMEM((bm, bn), jnp.float32)]
        sem = ("parallel", "parallel", "arbitrary")
    else:
        # single-K fast path: no accumulator scratch, no init/finalize revisits
        kernel = functools.partial(_mm_kernel_single_k, act=act, has_res=has_res)
        grid = (Mp // bm, Np // bn)
        in_specs = [
            pl.BlockSpec((bm, Kp), lambda i, j: (i, 0)),
            pl.BlockSpec((Kp, bn), lambda i, j: (0, j)),
            pl.BlockSpec((1, bn), lambda i, j: (0, j)),
        ]
        res_spec = pl.BlockSpec((bm, bn), lambda i, j: (i, j))
        out_spec = pl.BlockSpec((bm, bn), lambda i, j: (i, j))
        scratch = []
        sem = ("parallel", "parallel")

    inputs = [xp, wp, bp]
    if has_res:
        inputs.append(_pad2(residual, Mp, Np, jnp.bfloat16))
        in_specs.append(res_spec)

    out = pl.pallas_call(
        kernel,
        out_shape=jax.ShapeDtypeStruct((Mp, Np), out_dtype),
        grid_spec=pltpu.PrefetchScalarGridSpec(
            num_scalar_prefetch=0,
            grid=grid,
            in_specs=in_specs,
            out_specs=out_spec,
            scratch_shapes=scratch,
        ),
        compiler_params=pltpu.CompilerParams(
            dimension_semantics=sem, vmem_limit_bytes=VMEM_LIMIT),
        cost_estimate=cost,
    )(*inputs)
    return out[:M, :N]


# ----------------------------------------------------------------------------
# Pallas kernel 2: fused dense 3x3 stride-1 conv (no HBM im2col)
#   The kh*kw taps are accumulated on the MXU from a single VMEM halo tile.
# ----------------------------------------------------------------------------
def _conv3x3_kernel(x_ref, w_ref, b_ref, o_ref, *, kh, kw, act):
    ho, wo, bn = o_ref.shape[1], o_ref.shape[2], o_ref.shape[3]
    cin = x_ref.shape[3]
    acc = jnp.zeros((ho * wo, bn), jnp.float32)
    for di in range(kh):                              # static unroll over taps
        for dj in range(kw):
            slab = x_ref[0, di:di + ho, dj:dj + wo, :]
            acc = acc + jnp.dot(slab.reshape(ho * wo, cin),
                                w_ref[di * kw + dj],
                                preferred_element_type=jnp.float32)
    y = acc + b_ref[...]
    if act == "relu":
        y = jnp.maximum(y, 0.0)
    elif act == "swish":
        y = _swish(y)
    o_ref[...] = y.reshape(1, ho, wo, bn).astype(o_ref.dtype)


@functools.partial(jax.jit, static_argnames=("act", "out_dtype"))
def conv3x3_fused(x, w, scale, bias, *, act="relu", out_dtype=jnp.bfloat16):
    """Dense 3x3 stride-1 'same' conv + folded BN + act (used by the Up block)."""
    N, H, W, Cin = x.shape
    Cout = w.shape[0]
    kh, kw = 3, 3
    cin_p = _round_up(Cin, 128)
    wo_p = _round_up(W, 8)                  # tile-friendly in-kernel reshape
    bn_ = _pick_block(Cout, BN_CAP, 128)
    cout_p = _round_up(Cout, bn_)

    # one halo-padded copy of the activation (vs. the old 9x im2col blow-up)
    xp = jnp.pad(x.astype(jnp.bfloat16),
                 ((0, 0), (1, 1), (1, wo_p - W + 1), (0, cin_p - Cin)))
    wt = jnp.transpose(w, (2, 3, 1, 0)).reshape(kh * kw, Cin, Cout)
    wt = wt * scale[None, None, :]
    wt = jnp.pad(wt.astype(jnp.bfloat16),
                 ((0, 0), (0, cin_p - Cin), (0, cout_p - Cout)))
    bp = jnp.pad(bias.astype(jnp.float32), (0, cout_p - Cout)).reshape(1, cout_p)

    cost = pl.CostEstimate(
        flops=2 * N * H * wo_p * cin_p * cout_p * kh * kw,
        transcendentals=0,
        bytes_accessed=xp.size * 2 + wt.size * 2 + N * H * wo_p * cout_p * 2)

    out = pl.pallas_call(
        functools.partial(_conv3x3_kernel, kh=kh, kw=kw, act=act),
        out_shape=jax.ShapeDtypeStruct((N, H, wo_p, cout_p), out_dtype),
        grid_spec=pltpu.PrefetchScalarGridSpec(
            num_scalar_prefetch=0,
            grid=(N, cout_p // bn_),
            in_specs=[
                pl.BlockSpec((1, H + 2, wo_p + 2, cin_p), lambda n, j: (n, 0, 0, 0)),
                pl.BlockSpec((kh * kw, cin_p, bn_), lambda n, j: (0, 0, j)),
                pl.BlockSpec((1, bn_), lambda n, j: (0, j)),
            ],
            out_specs=pl.BlockSpec((1, H, wo_p, bn_), lambda n, j: (n, 0, 0, j)),
        ),
        compiler_params=pltpu.CompilerParams(
            dimension_semantics=("parallel", "parallel"),
            vmem_limit_bytes=VMEM_LIMIT),
        cost_estimate=cost,
    )(xp, wt, bp)
    return out[:, :, :W, :Cout]


# ----------------------------------------------------------------------------
# Pallas kernel 3: fused depthwise conv (+ folded BN bias + swish)
#   Tap MACs on the VPU from one VMEM halo tile; stride-2 uses a space-to-depth
#   phase split of the padded input (1x HBM traffic, no (T,M,C) taps tensor).
# ----------------------------------------------------------------------------
def _dw_kernel(x_ref, w_ref, b_ref, o_ref, *, ksize, stride):
    ho, wo = o_ref.shape[1], o_ref.shape[2]
    acc = None
    for di in range(ksize):                           # static unroll over taps
        for dj in range(ksize):
            ph = (di % stride) * stride + (dj % stride)
            oi, oj = di // stride, dj // stride
            xt = x_ref[ph, oi:oi + ho, oj:oj + wo, :]
            t = di * ksize + dj
            term = xt * w_ref[t:t + 1, :]             # bf16 * f32 -> f32
            acc = term if acc is None else acc + term
    y = acc + b_ref[0:1, :]
    o_ref[...] = _swish(y)[None].astype(o_ref.dtype)  # MBConv dw epilogue is BN+swish


def _tf_same_pad(size, k, s):
    out = -(-size // s)
    pad = max((out - 1) * s + k - size, 0)
    return pad // 2, pad - pad // 2, out


@functools.partial(jax.jit, static_argnames=("stride", "ksize"))
def depthwise_conv(x, w, scale, bias, *, stride, ksize):
    """Depthwise kxk conv (TF 'same' pad) + folded BN + swish."""
    N, H, W, C = x.shape
    pt, pb, Ho = _tf_same_pad(H, ksize, stride)
    pa, pr, Wo = _tf_same_pad(W, ksize, stride)
    bc = _pick_block(C, 512, 128)
    Cp = _round_up(C, bc)

    xp = jnp.pad(x.astype(jnp.bfloat16),
                 ((0, 0), (pt, pb), (pa, pr), (0, Cp - C)))
    Hp, Wp = xp.shape[1], xp.shape[2]
    s = stride
    if s == 1:
        phases = xp
        Hh, Wh = Hp, Wp
        nphase = 1
    else:
        # space-to-depth phase split: one re-layout copy instead of k*k im2col taps
        Hp2, Wp2 = _round_up(Hp, s), _round_up(Wp, s)
        xp = jnp.pad(xp, ((0, 0), (0, Hp2 - Hp), (0, Wp2 - Wp), (0, 0)))
        Hh, Wh = Hp2 // s, Wp2 // s
        phases = xp.reshape(N, Hh, s, Wh, s, Cp).transpose(0, 2, 4, 1, 3, 5)
        phases = phases.reshape(N * s * s, Hh, Wh, Cp)
        nphase = s * s

    wt = jnp.transpose(w.reshape(C, ksize * ksize), (1, 0)) * scale[None, :]
    wt = jnp.pad(wt.astype(jnp.float32), ((0, 0), (0, Cp - C)))
    bp = jnp.pad(bias.astype(jnp.float32), (0, Cp - C)).reshape(1, Cp)

    out = pl.pallas_call(
        functools.partial(_dw_kernel, ksize=ksize, stride=s),
        out_shape=jax.ShapeDtypeStruct((N, Ho, Wo, Cp), jnp.bfloat16),
        grid_spec=pltpu.PrefetchScalarGridSpec(
            num_scalar_prefetch=0,
            grid=(N, Cp // bc),
            in_specs=[
                pl.BlockSpec((nphase, Hh, Wh, bc), lambda n, j: (n, 0, 0, j)),
                pl.BlockSpec((ksize * ksize, bc), lambda n, j: (0, j)),
                pl.BlockSpec((1, bc), lambda n, j: (0, j)),
            ],
            out_specs=pl.BlockSpec((1, Ho, Wo, bc), lambda n, j: (n, 0, 0, j)),
        ),
        compiler_params=pltpu.CompilerParams(
            dimension_semantics=("parallel", "parallel"),
            vmem_limit_bytes=VMEM_LIMIT),
    )(phases, wt, bp)
    return out[..., :C]


# ----------------------------------------------------------------------------
# Pallas kernel 4: depth softmax + outer product, lane-dense output layout
#   Blocks are (1, C, D, bm) with the H*W axis on the 128-lane dim, emitted
#   directly in (N, C, D, H*W) order -> no trailing full-tensor transpose.
# ----------------------------------------------------------------------------
def _splat_kernel(d_ref, f_ref, o_ref):
    logits = d_ref[0]                                   # (D, bm)
    m = jnp.max(logits, axis=0, keepdims=True)
    e = jnp.exp(logits - m)
    depth = e / jnp.sum(e, axis=0, keepdims=True)       # exact normalization
    # single broadcasted store: o[c, d, m] = feats[c, m] * depth[d, m]
    o_ref[...] = (f_ref[0][:, None, :] * depth[None, :, :])[None]


@jax.jit
def _depth_splat(logits_t, feats_t):
    """logits_t:(N,D,M) feats_t:(N,C,M) -> (N,C,D,M) = feats x softmax_D(logits)."""
    N, D, M = logits_t.shape
    C = feats_t.shape[1]
    if M >= 128:
        bm = _pick_block(M, 512, 128)
        Mp = _round_up(M, bm)
    else:
        bm, Mp = M, M
    lp = jnp.pad(logits_t.astype(jnp.float32), ((0, 0), (0, 0), (0, Mp - M)))
    fp = jnp.pad(feats_t.astype(jnp.float32), ((0, 0), (0, 0), (0, Mp - M)))
    out = pl.pallas_call(
        _splat_kernel,
        out_shape=jax.ShapeDtypeStruct((N, C, D, Mp), jnp.float32),
        grid_spec=pltpu.PrefetchScalarGridSpec(
            num_scalar_prefetch=0,
            grid=(N, Mp // bm),
            in_specs=[
                pl.BlockSpec((1, D, bm), lambda n, i: (n, 0, i)),
                pl.BlockSpec((1, C, bm), lambda n, i: (n, 0, i)),
            ],
            out_specs=pl.BlockSpec((1, C, D, bm), lambda n, i: (n, 0, 0, i)),
        ),
        compiler_params=pltpu.CompilerParams(
            dimension_semantics=("parallel", "parallel"),
            vmem_limit_bytes=VMEM_LIMIT),
    )(lp, fp)
    return out[..., :M]


# ----------------------------------------------------------------------------
# Convolution wrappers (plain-JAX glue feeding the Pallas kernels)
# ----------------------------------------------------------------------------
def fold_bn(bn, eps=1e-5):
    scale = bn["gamma"] / jnp.sqrt(bn["var"] + eps)
    bias = bn["beta"] - bn["mean"] * scale
    return scale, bias


def conv1x1(x, w, scale, bias, *, act="none", residual=None,
            out_dtype=jnp.bfloat16):
    """Pointwise conv + folded BN + activation (+ fused residual), MXU kernel."""
    N, H, W, Cin = x.shape
    Cout = w.shape[0]
    wmat = w.reshape(Cout, Cin).T * scale[None, :]
    res = residual.reshape(N * H * W, Cout) if residual is not None else None
    out = _fused_matmul(x.reshape(N * H * W, Cin), wmat, bias, res,
                        act=act, out_dtype=out_dtype)
    return out.reshape(N, H, W, Cout)


def conv_stem(x, w, scale, bias, *, stride=2, act="swish"):
    """Stem 3x3 s2 conv (TF same pad) + folded BN + swish."""
    # TODO(synk): the stem keeps an im2col glue path (Cin=3 -> 27-wide patches,
    #             negligible blow-up); the FLOP-heavy 3x3 convs (Up block) use
    #             the fused halo-tile kernel instead.
    N, H, W, Cin = x.shape
    Cout, _, kh, kw = w.shape
    pt, pb, Ho = _tf_same_pad(H, kh, stride)
    pa, pr, Wo = _tf_same_pad(W, kw, stride)
    xp = jnp.pad(x.astype(jnp.bfloat16), ((0, 0), (pt, pb), (pa, pr), (0, 0)))
    cols = [xp[:, i:i + stride * (Ho - 1) + 1:stride,
               j:j + stride * (Wo - 1) + 1:stride, :]
            for i in range(kh) for j in range(kw)]
    patches = jnp.concatenate(cols, axis=-1).reshape(N * Ho * Wo, kh * kw * Cin)
    wmat = jnp.transpose(w, (2, 3, 1, 0)).reshape(kh * kw * Cin, Cout)
    wmat = wmat * scale[None, :]
    out = _fused_matmul(patches, wmat, bias, None, act=act,
                        out_dtype=jnp.bfloat16)
    return out.reshape(N, Ho, Wo, Cout)


def se_block(x, rw, rb, ew, eb):
    """Squeeze-and-Excitation (tiny FCs stay in plain JAX; gate applied in bf16)."""
    # TODO(synk): fully folding the per-(image, channel) gate into the project
    #             conv's matmul prologue needs an image-aligned grid axis; the
    #             gating multiply is kept in bf16 to avoid the old f32 round trip.
    N, H, W, Cexp = x.shape
    cse = rw.shape[0]
    s = jnp.mean(x.astype(jnp.float32), axis=(1, 2))               # (N, Cexp)
    s = s @ rw.reshape(cse, Cexp).T + rb
    s = s * jax.nn.sigmoid(s)                                       # swish
    s = s @ ew.reshape(Cexp, cse).T + eb
    gate = jax.nn.sigmoid(s).astype(jnp.bfloat16)
    return x * gate[:, None, None, :]


def _interp_matrix(n_in, n_out):
    if n_in == 1:
        return jnp.ones((n_out, 1), jnp.float32)
    src = jnp.arange(n_out, dtype=jnp.float32) * (n_in - 1) / (n_out - 1)
    lo = jnp.clip(jnp.floor(src).astype(jnp.int32), 0, n_in - 2)
    frac = src - lo.astype(jnp.float32)
    rows = jnp.arange(n_out)
    m = jnp.zeros((n_out, n_in), jnp.float32)
    m = m.at[rows, lo].add(1.0 - frac)
    m = m.at[rows, lo + 1].add(frac)
    return m


def upsample_bilinear(x, scale):
    # TODO(synk): bilinear align_corners=True upsample stays as a separable
    #             plain-JAX einsum; the surrounding convs are the hot path.
    N, H, W, C = x.shape
    x = x.astype(jnp.float32)
    x = jnp.einsum("oh,nhwc->nowc", _interp_matrix(H, H * scale), x)
    x = jnp.einsum("ow,nhwc->nhoc", _interp_matrix(W, W * scale), x)
    return x


# ----------------------------------------------------------------------------
# EfficientNet-b0 MBConv block (inference; drop_connect is identity at eval)
# ----------------------------------------------------------------------------
def mbconv(x, p):
    inp = x
    if p["expand"] != 1:
        s, b = fold_bn(p["bn0"], eps=1e-3)
        x = conv1x1(x, p["expand_w"], s, b, act="swish")
    s, b = fold_bn(p["bn1"], eps=1e-3)
    x = depthwise_conv(x, p["dw_w"], s, b, stride=p["stride"], ksize=p["kernel"])
    x = se_block(x, p["se_rw"], p["se_rb"], p["se_ew"], p["se_eb"])
    s, b = fold_bn(p["bn2"], eps=1e-3)
    res = inp if (p["stride"] == 1 and p["in_ch"] == p["out_ch"]) else None
    x = conv1x1(x, p["project_w"], s, b, act="none", residual=res)
    return x


# ----------------------------------------------------------------------------
# CamEncode forward
# ----------------------------------------------------------------------------
def cam_encode(x_nchw, params, D, C):
    x = jnp.transpose(x_nchw, (0, 2, 3, 1)).astype(jnp.bfloat16)    # -> NHWC

    # EfficientNet-b0 stem: conv3x3 s2 (TF same pad) + BN + swish
    s, b = fold_bn(params["stem_bn"], eps=1e-3)
    x = conv_stem(x, params["stem_w"], s, b, stride=2, act="swish")

    # MBConv blocks, recording endpoints whenever the spatial size drops
    endpoints = []
    for p in params["blocks"]:
        x_new = mbconv(x, p)
        if x_new.shape[1] < x.shape[1]:
            endpoints.append(x)
        x = x_new
    endpoints.append(x)
    red4, red5 = endpoints[-2], endpoints[-1]   # reduction_4 (112ch), reduction_5 (320ch)

    # Up(320+112, 512): upsample x2 + cat([red4, up(red5)]) + 2x(conv3x3+BN+ReLU)
    xu = upsample_bilinear(red5, 2)
    xc = jnp.concatenate([red4.astype(jnp.float32), xu], axis=-1)
    s, b = fold_bn(params["up_bn1"])
    x = conv3x3_fused(xc, params["up_w1"], s, b, act="relu")
    s, b = fold_bn(params["up_bn2"])
    x = conv3x3_fused(x, params["up_w2"], s, b, act="relu")

    # depthnet: 1x1 conv with bias, no BN / activation -> D + C channels
    ones = jnp.ones((D + C,), jnp.float32)
    y = conv1x1(x, params["depthnet_w"], ones, params["depthnet_b"],
                act="none", out_dtype=jnp.float32)

    # depth softmax over D + outer product with the C context features,
    # emitted directly in (N, C, D, H, W) layout (lane-dense splat kernel).
    N, Hf, Wf, _ = y.shape
    M = Hf * Wf
    yt = jnp.transpose(y.reshape(N, M, D + C), (0, 2, 1))   # small (N, D+C, M)
    out = _depth_splat(yt[:, :D, :], yt[:, D:D + C, :])      # (N, C, D, M)
    return out.reshape(N, C, D, Hf, Wf)


# ----------------------------------------------------------------------------
# Parameter construction (deterministic synthetic weights, b0 architecture)
# ----------------------------------------------------------------------------
B0_BLOCK_ARGS = [
    # (repeats, kernel, stride, expand_ratio, in_ch, out_ch)
    (1, 3, 1, 1, 32, 16),
    (2, 3, 2, 6, 16, 24),
    (2, 5, 2, 6, 24, 40),
    (3, 3, 2, 6, 40, 80),
    (3, 5, 1, 6, 80, 112),
    (4, 5, 2, 6, 112, 192),
    (1, 3, 1, 6, 192, 320),
]


class _KeyGen:
    def __init__(self, key):
        self._key = key
        self._i = 0

    def __call__(self):
        self._i += 1
        return jax.random.fold_in(self._key, self._i)


def make_params(D, C, key):
    kg = _KeyGen(key)

    def conv(cout, cin, k):
        fan = cin * k * k
        return jax.random.normal(kg(), (cout, cin, k, k), jnp.float32) / np.sqrt(fan)

    def dwconv(ch, k):
        return jax.random.normal(kg(), (ch, 1, k, k), jnp.float32) / np.sqrt(k * k)

    def bn(c):
        return dict(
            gamma=1.0 + 0.1 * jax.random.normal(kg(), (c,), jnp.float32),
            beta=0.1 * jax.random.normal(kg(), (c,), jnp.float32),
            mean=0.1 * jax.random.normal(kg(), (c,), jnp.float32),
            var=1.0 + 0.1 * jnp.abs(jax.random.normal(kg(), (c,), jnp.float32)),
        )

    def bias(c):
        return 0.05 * jax.random.normal(kg(), (c,), jnp.float32)

    blocks = []
    for (reps, k, s, e, cin, cout) in B0_BLOCK_ARGS:
        for r in range(reps):
            bcin = cin if r == 0 else cout
            bstride = s if r == 0 else 1
            oup = bcin * e
            cse = max(1, int(bcin * 0.25))
            p = dict(kernel=k, stride=bstride, expand=e, in_ch=bcin, out_ch=cout)
            if e != 1:
                p["expand_w"] = conv(oup, bcin, 1)
                p["bn0"] = bn(oup)
            p["dw_w"] = dwconv(oup, k)
            p["bn1"] = bn(oup)
            p["se_rw"] = conv(cse, oup, 1)
            p["se_rb"] = bias(cse)
            p["se_ew"] = conv(oup, cse, 1)
            p["se_eb"] = bias(oup)
            p["project_w"] = conv(cout, oup, 1)
            p["bn2"] = bn(cout)
            blocks.append(p)

    return dict(
        stem_w=conv(32, 3, 3), stem_bn=bn(32),
        blocks=blocks,
        up_w1=conv(512, 320 + 112, 3), up_bn1=bn(512),
        up_w2=conv(512, 512, 3), up_bn2=bn(512),
        depthnet_w=conv(D + C, 512, 1), depthnet_b=bias(D + C),
    )


# ----------------------------------------------------------------------------
if __name__ == "__main__":
    key = jax.random.PRNGKey(0)
    k_in, k_par = jax.random.split(key)

    batch, in_ch, H, W = 2, 3, 64, 64     # small RGB camera images
    D, C = 4, 8                           # small depth-bin / context-channel counts

    x = jax.random.normal(k_in, (batch, in_ch, H, W), jnp.float32)
    params = make_params(D, C, k_par)

    out = cam_encode(x, params, D, C)
    out = jax.block_until_ready(out)

    assert out.shape == (batch, C, D, H // 16, W // 16), out.shape
    assert bool(jnp.all(jnp.isfinite(out)))
    print("KERNEL_OK")
</pallas_src>

<mosaic_0001>
module attributes {stable_mosaic.version = 11 : i64} {
  func.func @_mm_kernel_single_k(%arg0: i32, %arg1: i32, %arg2: memref<512x128xbf16, #tpu.memory_space<vmem>>, %arg3: memref<128x128xbf16, #tpu.memory_space<vmem>>, %arg4: memref<1x128xf32, #tpu.memory_space<vmem>>, %arg5: memref<512x128xbf16, #tpu.memory_space<vmem>>) attributes {dimension_semantics = [#tpu.dimension_semantics<parallel>, #tpu.dimension_semantics<parallel>], iteration_bounds = array<i64: 4, 1>, scalar_prefetch = 0 : i64, scratch_operands = 0 : i64, tpu.core_type = #tpu.core_type<tc>, window_params = [{transform_indices = @transform_0, window_bounds = array<i64: 512, 128>}, {transform_indices = @transform_1, window_bounds = array<i64: 128, 128>}, {transform_indices = @transform_2, window_bounds = array<i64: 1, 128>}, {transform_indices = @transform_3, window_bounds = array<i64: 512, 128>}]} {
    %c0 = arith.constant 0 : index
    %c0_0 = arith.constant 0 : index
    %0 = vector.load %arg2[%c0, %c0_0] : memref<512x128xbf16, #tpu.memory_space<vmem>>, vector<512x128xbf16>
    %c0_1 = arith.constant 0 : index
    %c0_2 = arith.constant 0 : index
    %1 = vector.load %arg3[%c0_1, %c0_2] : memref<128x128xbf16, #tpu.memory_space<vmem>>, vector<128x128xbf16>
    %cst = arith.constant dense<0.000000e+00> : vector<512x128xf32>
    %2 = tpu.matmul %0, %1, %cst {dimension_numbers = #tpu.dot_dimension_numbers<[1], [0], [0], [1], [0, 0, 1, 1], [], []>} : vector<512x128xbf16>, vector<128x128xbf16>, vector<512x128xf32> -> vector<512x128xf32>
    %c0_3 = arith.constant 0 : index
    %c0_4 = arith.constant 0 : index
    %3 = vector.load %arg4[%c0_3, %c0_4] : memref<1x128xf32, #tpu.memory_space<vmem>>, vector<1x128xf32>
    %4 = vector.broadcast %3 : vector<1x128xf32> to vector<512x128xf32>
    %5 = arith.addf %2, %4 : vector<512x128xf32>
    %cst_5 = arith.constant 0.000000e+00 : f32
    %6 = vector.broadcast %cst_5 : f32 to vector<512x128xf32>
    %7 = arith.subf %6, %5 : vector<512x128xf32>
    %8 = math.exp %7 : vector<512x128xf32>
    %cst_6 = arith.constant 1.000000e+00 : f32
    %9 = vector.broadcast %cst_6 : f32 to vector<512x128xf32>
    %10 = arith.addf %9, %8 : vector<512x128xf32>
    %11 = arith.divf %5, %10 : vector<512x128xf32>
    %12 = arith.truncf %11 : vector<512x128xf32> to vector<512x128xbf16>
    %c0_7 = arith.constant 0 : index
    %c0_8 = arith.constant 0 : index
    %13 = vector.load %arg5[%c0_7, %c0_8] : memref<512x128xbf16, #tpu.memory_space<vmem>>, vector<512x128xbf16>
    tpu.vector_store %arg5[%c0_7, %c0_8], %12 {strides = array<i32>} : memref<512x128xbf16, #tpu.memory_space<vmem>>, vector<512x128xbf16>,
    return
  }
  func.func @transform_0(%arg0: i32, %arg1: i32) -> (i32, i32) {
    %c0_i32 = arith.constant 0 : i32
    %c0_i32_0 = arith.constant 0 : i32
    return %arg0, %c0_i32 : i32, i32
  }
  func.func @transform_1(%arg0: i32, %arg1: i32) -> (i32, i32) {
    %c0_i32 = arith.constant 0 : i32
    %c0_i32_0 = arith.constant 0 : i32
    return %c0_i32, %arg1 : i32, i32
  }
  func.func @transform_2(%arg0: i32, %arg1: i32) -> (i32, i32) {
    %c0_i32 = arith.constant 0 : i32
    %c0_i32_0 = arith.constant 0 : i32
    return %c0_i32, %arg1 : i32, i32
  }
  func.func @transform_3(%arg0: i32, %arg1: i32) -> (i32, i32) {
    %c0_i32 = arith.constant 0 : i32
    return %arg0, %arg1 : i32, i32
  }
}

</mosaic_0001>

<bundles_post_ra>
// kernel: _fused_matmul.1
= control target key start
LH: loop header
LB: loop body
LE: loop exit
PB: predicated region body
PF: predicated region fallthrough
CT: control target
= control target key end

     0   :  { %8 = vsyncpa [#allocation3], 0  ;;  %s3576_s0 = inlined_call_operand.hbm [shape: bf16[2048,128], index: 0, kind: input, shape index: {}]   ;;  %s3577_s1 = inlined_call_operand.hbm [shape: bf16[128,128], index: 1, kind: input, shape index: {}]   ;;  %s3578_s2 = inlined_call_operand.hbm [shape: f32[1,128], index: 2, kind: input, shape index: {}]   ;;  %s3579_s3 = inlined_call_operand.hbm [shape: bf16[2048,128], index: 3, kind: output, shape index: {}]  }
   0x1   :  { %10 = vsyncpa [#allocation3 + $0x1], 0 }
   0x2   :  { %11 = vsyncpa [#allocation6], 0 }
   0x3   :  { %12 = vsyncpa [#allocation4], 0 }
   0x4   :  { %14 = vsyncpa [#allocation4 + $0x1], 0  ;;  %s2791_s12 = smov 0   ;;  %s2793_s13 = smov 0  }
   0x5   :  { %s2795_s14 = smov 0   ;;  %s2797_s15 = smov 0  }
   0x6   :  { %s2799_s16 = smov 0   ;;  %s2801_s17 = smov 0  }
   0x7 LB: > { %s1688_s18 = sadd.s32 4294967295, %s2761_s17   ;;  %s1689_s19 = sadd.s32 4294967294, %s2761_s17   ;;  %s2761_s17 = sphi %s2801_s17, %s20_s17   ;;  %s2757_s16 = sphi %s2799_s16, %s3627_s16   ;;  %s2753_s15 = sphi %s2797_s15, %s3626_s15   ;;  %s2749_s14 = sphi %s2795_s14, %s3625_s14   ;;  %s2745_s13 = sphi %s2793_s13, %s3624_s13   ;;  %s2741_s12 = sphi %s2791_s12, %s3623_s12  }
   0x8   : > { %p52_p0 = scmp.ne.s32.totalorder %s2745_s13, %s2741_s12  ;;  %p2825_p1 = scmp.eq.s32.totalorder %s1688_s18, 0 }
   0x9   : > { %p2829_p2 = scmp.eq.s32.totalorder %s1688_s18, 3  ;;  %p136_p3 = scmp.eq.s32.totalorder %s1689_s19, 3 }
   0xa   : > { %s3586_s20 = scalar_select %p2825_p1, 1, 0 }
   0xb   : > { %s3587_s21 = scalar_select %p2829_p2, 1, 0 }
   0xc   : > { %p2835_p4 = por %p2825_p1, %p52_p0  ;;  %p1690_p5 = scmp.ge.s32.totalorder %s2761_s17, 1 }
   0xd   : > { %p2840_p6 = por %p136_p3, %p52_p0  ;;  %p143_p7 = scmp.lt.s32.totalorder %s2761_s17, 5 }
   0xe   : > { %s3588_s22 = scalar_select %p2835_p4, 1, 0 }
   0xf   : > { %s3589_s23 = scalar_select %p2840_p6, 1, 0 }
  0x10   : > { %p2845_p8 = pnand %p1690_p5, %p143_p7  ;;  %s2763_s25 = smov [#allocation5]  }
  0x11   : > { %s157_s26 = sshll.u32 %s2763_s25, 4  ;;  %s2764_s28 = smov [#allocation7]   ;;  %s158_s26 = int_to_ptr.vmem [resolvable:$true] %s157_s26 }
  0x12   : > { %s3590_s24 = scalar_select %p2845_p8, 1, 0 }
  0x13   : > { %p2217_p9 = pneg %p2845_p8  ;;  %s173_s29 = sshll.u32 %s2764_s28, 4  ;;  %s2857_s29 = int_to_ptr.vmem [resolvable:$true] %s173_s29 }
  0x14   : > { %s2589_s5 = scalar_lea.hbm %s3577_s1, 1024 }
  0x15   : > { %p2853_p10 = pnand %p2217_p9, %p2825_p1  ;;  %p2590_p11 = scmp.ne.s32.totalorder %s3577_s1, %s2589_s5 }
  0x16   : > { %p2596_p3 = scmp.lt.u32.totalorder %s2589_s5, %s3577_s1 }
  0x17   : > { %p2591_p12 = pneg %p2853_p10 }
  0x19   : > { %p2592_p13 = pnand %p2591_p12, %p2590_p11 }
  0x1b   : > { %p2593_p0 = pneg %p2592_p13 }
  0x1d   : > { %p2598_p5 = pnand %p2596_p3, %p2593_p0 }
  0x1f   : > { %2601 = shalt.err (!%p2598_p5)
}
  0x20   : > { %s2602_s10 = scalar_lea.vmem %s158_s26, 1024  ;;  %p2610_p1 = scmp.lt.s32.totalorder %s158_s26, %s158_s26 }
  0x21   : > { %p2603_p7 = scmp.ne.s32.totalorder %s158_s26, %s2602_s10  ;;  %p2611_p4 = scmp.lt.s32.totalorder %s2602_s10, %s2602_s10 }
  0x23   : > { %p2605_p9 = pnand %p2603_p7, %p2591_p12  ;;  %p2612_p8 = por %p2611_p4, %p2610_p1 }
  0x25   : > { %p2606_p6 = pneg %p2605_p9 }
  0x27   : > { %p2613_p2 = pnand %p2612_p8, %p2606_p6 }
  0x29   : > { %2616 = shalt.err (!%p2613_p2)
}
  0x2a   : > { %s2765_s11 = smov 64   ;;  %s2766_s18 = smov 4  }
  0x2b   : > { %2220 = dma.hbm_to_vmem [thread:$0]  (!%p2853_p10), %s3577_s1, 1024, %s158_s26, [#allocation6], %s2765_s11, %s2765_s11, %s2766_s18  }
  0x2c   : > { %s2617_s4 = scalar_lea.hbm %s3578_s2, 16 }
  0x2d   : > { %p2618_p1 = scmp.ne.s32.totalorder %s3578_s2, %s2617_s4  ;;  %p2624_p6 = scmp.lt.u32.totalorder %s2617_s4, %s3578_s2 }
  0x2f   : > { %p2620_p2 = pnand %p2618_p1, %p2591_p12 }
  0x31   : > { %p2621_p4 = pneg %p2620_p2 }
  0x33   : > { %p2626_p8 = pnand %p2624_p6, %p2621_p4 }
  0x35   : > { %2629 = shalt.err (!%p2626_p8)
}
  0x36   : > { %s2630_s26 = scalar_lea.vmem %s2857_s29, 16  ;;  %s2637_s9 = scalar_lea.vmem %s2857_s29, 32 }
  0x37   : > { %p2631_p11 = scmp.ne.s32.totalorder %s2857_s29, %s2630_s26  ;;  %p2638_p3 = scmp.lt.s32.totalorder %s2857_s29, %s2857_s29 }
  0x38   : > { %p2639_p5 = scmp.lt.s32.totalorder %s2637_s9, %s2630_s26 }
  0x39   : > { %p2633_p13 = pnand %p2631_p11, %p2591_p12 }
  0x3a   : > { %p2640_p7 = por %p2639_p5, %p2638_p3 }
  0x3b   : > { %p2634_p0 = pneg %p2633_p13 }
  0x3d   : > { %p2641_p9 = pnand %p2640_p7, %p2634_p0 }
  0x3f   : > { %2644 = shalt.err (!%p2641_p9)
}
  0x40   : > { %2223 = dma.hbm_to_vmem [thread:$0]  (!%p2853_p10), %s3578_s2, 16, %s2857_s29, [#allocation6]  }
  0x41   : > { %s32_s25 = sadd.s32 1, %s2757_s16  ;;  %s39_s28 = sadd.s32 1, %s2749_s14 }
  0x42   : > { %p34_p12 = scmp.ge.s32.totalorder %s32_s25, 4  ;;  %p46_p1 = scmp.ne.s32.totalorder %s2749_s14, %s2745_s13 }
  0x43   : > { %p47_p2 = scmp.eq.s32.totalorder %s2761_s17, 0  ;;  %p2234_p4 = scmp.lt.s32.totalorder %s2761_s17, 4 }
  0x44   : > { %s3629_s25 = smov (%p34_p12, %s32_s25), 0  ;;  %p3592_p8 = scmp.ne.s32.totalorder %s3587_s21, 0 }
  0x45   : > { %p48_p6 = por %p47_p2, %p46_p1  ;;  %s36_s30 = ssub.s32 %s2757_s16, %s3629_s25 }
  0x46   : > { %p2920_p11 = por %p3592_p8, %p46_p1  ;;  %s184_s4 = sand.u32 1, %s2749_s14  }
  0x47   : > { %p37_p13 = scmp.eq.s32.totalorder %s36_s30, 0  ;;  %s1694_s29 = sshll.u32 %s184_s4, 8 }
  0x48   : > { %s1812_s5 = sshll.u32 %s2757_s16, 12  ;;  %s188_s21 = scalar_lea.vmem [#allocation2], %s1694_s29 }
  0x49   : > { %s2929_s6 = scalar_select %p37_p13, %s2749_s14, %s39_s28  }
  0x4a   : > { %s2934_s26 = scalar_lea.hbm %s3576_s0, %s1812_s5  ;;  %s195_s9 = sshll.u32 %s188_s21, 4  ;;  %s2942_s9 = int_to_ptr.vmem [resolvable:$true] %s195_s9 }
  0x4b   : > { %p2938_p10 = pnand %p2234_p4, %p48_p6  ;;  %s2944_s19 = scalar_lea.sflag [#allocation3], %s184_s4 }
  0x4c   : > { %s2645_s28 = scalar_lea.hbm %s2934_s26, 4096  ;;  %s2650_s5 = scalar_lea.hbm %s3576_s0, 16384 }
  0x4d   : > { %p2646_p0 = scmp.ne.s32.totalorder %s2934_s26, %s2645_s28  ;;  %p2647_p3 = pneg %p2938_p10 }
  0x4e   : > { %p2651_p9 = scmp.lt.u32.totalorder %s2934_s26, %s3576_s0  ;;  %p2652_p12 = scmp.lt.u32.totalorder %s2650_s5, %s2645_s28 }
  0x4f   : > { %p2648_p5 = pnand %p2647_p3, %p2646_p0  ;;  %p2654_p2 = scmp.lt.u32.totalorder %s2645_s28, %s2934_s26 }
  0x50   : > { %p2653_p1 = por %p2652_p12, %p2651_p9 }
  0x51   : > { %p2649_p7 = pneg %p2648_p5 }
  0x52   : > { %p2655_p4 = por %p2654_p2, %p2653_p1 }
  0x54   : > { %p2656_p6 = pnand %p2655_p4, %p2649_p7 }
  0x56   : > { %2659 = shalt.err (!%p2656_p6)
}
  0x57   : > { %s2660_s4 = scalar_lea.vmem %s2942_s9, 4096  ;;  %s2767_s21 = smov [#allocation2]  }
  0x58   : > { %p2661_p8 = scmp.ne.s32.totalorder %s2942_s9, %s2660_s4  ;;  %s2665_s30 = sshll.u32 %s2767_s21, 4  ;;  %s2666_s30 = int_to_ptr.vmem [resolvable:$false] %s2665_s30 }
  0x59   : > { %s2667_s29 = scalar_lea.vmem %s2666_s30, 8192  ;;  %p2668_p5 = scmp.lt.s32.totalorder %s2942_s9, %s2666_s30 }
  0x5a   : > { %p2663_p13 = pnand %p2661_p8, %p2647_p3  ;;  %p2669_p9 = scmp.lt.s32.totalorder %s2667_s29, %s2660_s4 }
  0x5c   : > { %p2664_p0 = pneg %p2663_p13  ;;  %p2670_p12 = por %p2669_p9, %p2668_p5 }
  0x5e   : > { %p2671_p1 = pnand %p2670_p12, %p2664_p0 }
  0x60   : > { %2674 = shalt.err (!%p2671_p1)
}
  0x61   : > { %2227 = dma.hbm_to_vmem [thread:$0]  (!%p2938_p10), %s2934_s26, 4096, %s2942_s9, %s2944_s19, %s2765_s11, %s2765_s11, %s2766_s18  }
  0x62   : > { %p3595_p3 = scmp.ne.s32.totalorder %s3590_s24, 0 }
  0x64   : > { %207 = sbr.rel (%p3595_p3) target bundleno = 525 (0x20d), region = 32 }
  0x6b   : > { %s2978_s28 = sand.u32 1, %s2745_s13   ;;  %p3596_p7 = scmp.ne.s32.totalorder %s3588_s22, 0 }
  0x6c   : > { %s1698_s5 = sshll.u32 %s2978_s28, 8  ;;  %s210_s7 = scalar_lea.sflag [#allocation3], %s2978_s28 }
  0x6d   : > { %s2984_s10 = scalar_lea.vmem [#allocation2], %s1698_s5 }
  0x6e   : > { %2728 = dma.done.wait (%p3596_p7), %s210_s7, 4096  }
  0x6f   : > { %2730 = vsyncadd (%p3596_p7), %s210_s7, 4294963200  ;;  %p3597_p10 = scmp.ne.s32.totalorder %s3586_s20, 0 }
  0x71   : > { %2732 = dma.done.wait (%p3597_p10), [#allocation6], 1040  }
  0x72   : > { %2734 = vsyncadd (%p3597_p10), [#allocation6], 4294966256  ;;  %v2292_v0 = vld [vmem:[#allocation5] sm:$0xff]   ;;  %v2293_v1 = vld [vmem:[#allocation5 + $0x8] sm:$0xff]   ;;  %s3174_s20 = scalar_lea.vmem [#allocation8], %s1698_s5  ;;  %s1877_s22 = sshll.u32 %s2753_s15, 12 }
  0x73   : > { %2109 = vmatprep.subr.bf16.mxu0 %v2292_v0  ;;  %2189 = vmatprep.subr.bf16.mxu1 %v2292_v0  ;;  %v2294_v2 = vld [vmem:[#allocation5 + $0x10] sm:$0xff]   ;;  %v2295_v3 = vld [vmem:[#allocation5 + $0x18] sm:$0xff]   ;;  %v2300_v4 = vld [vmem:[%s2984_s10] sm:$0xff]   ;;  %s1582_s24 = sshll.u32 %s3174_s20, 4  ;;  %s3523_s15 = scalar_lea.hbm %s3579_s3, %s1877_s22  ;;  %s3525_s24 = int_to_ptr.vmem [resolvable:$true] %s1582_s24 }
  0x74   : > { %2110 = vmatpush3.bf16.msra.mxu0 %v2292_v0  ;;  %2197 = vmatpush3.bf16.msra.mxu1 %v2292_v0  ;;  %v2301_v5 = vld [vmem:[%s2984_s10 + $0x80] sm:$0xff]   ;;  %v2297_v7 = vld [vmem:[#allocation5 + $0x28] sm:$0xff]   ;;  %v2298_v8 = vld [vmem:[#allocation5 + $0x30] sm:$0xff]   ;;  %s1568_s26 = scalar_lea.sflag [#allocation4], %s2978_s28  ;;  %s2675_s9 = scalar_lea.vmem %s3525_s24, 4096 }
  0x75   : > { %2111 = vmatprep.subr.bf16.mxu0 %v2293_v1  ;;  %2190 = vmatprep.subr.bf16.mxu1 %v2293_v1  ;;  %v2296_v6 = vld [vmem:[#allocation5 + $0x20] sm:$0xff]   ;;  %v2299_v9 = vld [vmem:[#allocation5 + $0x38] sm:$0xff]   ;;  %v2302_v10 = vld [vmem:[%s2984_s10 + $0x8] sm:$0xff]   ;;  %p2676_p2 = scmp.ne.s32.totalorder %s3525_s24, %s2675_s9  ;;  %s2768_s19 = smov [#allocation8]  }
  0x76   : > { %2125 = vmatprep.mubr.bf16.mxu0 %v2300_v4  ;;  %2157 = vmatprep.mubr.bf16.mxu1 %v2301_v5  ;;  %v2303_v11 = vld [vmem:[%s2984_s10 + $0x88] sm:$0xff]   ;;  %v2304_v12 = vld [vmem:[%s2984_s10 + $0x10] sm:$0xff]   ;;  %v2306_v14 = vld [vmem:[%s2984_s10 + $0x18] sm:$0xff]   ;;  %s2679_s8 = sshll.u32 %s2768_s19, 4  ;;  %s2680_s8 = int_to_ptr.vmem [resolvable:$false] %s2679_s8 }
  0x77   : > { %v2305_v13 = vld [vmem:[%s2984_s10 + $0x90] sm:$0xff]   ;;  %v2307_v15 = vld [vmem:[%s2984_s10 + $0x98] sm:$0xff]   ;;  %v2308_v16 = vld [vmem:[%s2984_s10 + $0x20] sm:$0xff]   ;;  %p2677_p4 = pnand %p2676_p2, %p2920_p11  ;;  %s2681_s4 = scalar_lea.vmem %s2680_s8, 8192 }
  0x78   : > { %2112 = vmatpush3.bf16.msra.mxu0 %v2293_v1  ;;  %2198 = vmatpush3.bf16.msra.mxu1 %v2293_v1  ;;  %v2309_v17 = vld [vmem:[%s2984_s10 + $0xa0] sm:$0xff]   ;;  %v2310_v18 = vld [vmem:[%s2984_s10 + $0x28] sm:$0xff]   ;;  %v2312_v20 = vld [vmem:[%s2984_s10 + $0x30] sm:$0xff]   ;;  %p2682_p8 = scmp.lt.s32.totalorder %s3525_s24, %s2680_s8  ;;  %p2683_p13 = scmp.lt.s32.totalorder %s2681_s4, %s2675_s9 }
  0x79   : > { %2113 = vmatprep.subr.bf16.mxu0 %v2294_v2  ;;  %2191 = vmatprep.subr.bf16.mxu1 %v2294_v2  ;;  %v2311_v19 = vld [vmem:[%s2984_s10 + $0xa8] sm:$0xff]   ;;  %v2313_v21 = vld [vmem:[%s2984_s10 + $0xb0] sm:$0xff]   ;;  %v2314_v22 = vld [vmem:[%s2984_s10 + $0x38] sm:$0xff]   ;;  %p2678_p6 = pneg %p2677_p4 }
  0x7a   : > { %v2315_v23 = vld [vmem:[%s2984_s10 + $0xb8] sm:$0xff]   ;;  %v2316_v24 = vld [vmem:[%s2984_s10 + $0x40] sm:$0xff]   ;;  %v2318_v26 = vld [vmem:[%s2984_s10 + $0x48] sm:$0xff]   ;;  %p2684_p0 = por %p2683_p13, %p2682_p8 }
  0x7b   : > { %v2317_v25 = vld [vmem:[%s2984_s10 + $0xc0] sm:$0xff]   ;;  %v2319_v27 = vld [vmem:[%s2984_s10 + $0xc8] sm:$0xff]   ;;  %v2320_v28 = vld [vmem:[%s2984_s10 + $0x50] sm:$0xff]  }
  0x7c   : > { %2114 = vmatpush3.bf16.msra.mxu0 %v2294_v2  ;;  %2199 = vmatpush3.bf16.msra.mxu1 %v2294_v2  ;;  %v2321_v29 = vld [vmem:[%s2984_s10 + $0xd0] sm:$0xff]   ;;  %v2322_v30 = vld [vmem:[%s2984_s10 + $0x58] sm:$0xff]   ;;  %v2324_v32 = vld [vmem:[%s2984_s10 + $0x60] sm:$0xff]   ;;  %p2685_p5 = pnand %p2684_p0, %p2678_p6 }
  0x7d   : > { %2115 = vmatprep.subr.bf16.mxu0 %v2295_v3  ;;  %2192 = vmatprep.subr.bf16.mxu1 %v2295_v3  ;;  %v2323_v31 = vld [vmem:[%s2984_s10 + $0xd8] sm:$0xff]   ;;  %v2325_v33 = vld [vmem:[%s2984_s10 + $0xe0] sm:$0xff]   ;;  %v2326_v34 = vld [vmem:[%s2984_s10 + $0x68] sm:$0xff]  }
  0x7e   : > { %v2327_v35 = vld [vmem:[%s2984_s10 + $0xe8] sm:$0xff]   ;;  %v2328_v36 = vld [vmem:[%s2984_s10 + $0x70] sm:$0xff]   ;;  %v2330_v38 = vld [vmem:[%s2984_s10 + $0x78] sm:$0xff]  }
  0x7f   : > { %v2329_v37 = vld [vmem:[%s2984_s10 + $0xf0] sm:$0xff]   ;;  %v2331_v39 = vld [vmem:[%s2984_s10 + $0xf8] sm:$0xff]   ;;  %v3026_v40 = vld [vmem:[#allocation7] ss:$0 sm:$0xff] }
  0x80   : > { %2116 = vmatpush3.bf16.msra.mxu0 %v2295_v3  ;;  %2200 = vmatpush3.bf16.msra.mxu1 %v2295_v3 }
  0x81   : > { %2117 = vmatprep.subr.bf16.mxu0 %v2296_v6  ;;  %2193 = vmatprep.subr.bf16.mxu1 %v2296_v6 }
  0x84   : > { %2118 = vmatpush3.bf16.msra.mxu0 %v2296_v6  ;;  %2201 = vmatpush3.bf16.msra.mxu1 %v2296_v6 }
  0x85   : > { %2119 = vmatprep.subr.bf16.mxu0 %v2297_v7  ;;  %2194 = vmatprep.subr.bf16.mxu1 %v2297_v7 }
  0x88   : > { %2120 = vmatpush3.bf16.msra.mxu0 %v2297_v7  ;;  %2202 = vmatpush3.bf16.msra.mxu1 %v2297_v7 }
  0x89   : > { %2121 = vmatprep.subr.bf16.mxu0 %v2298_v8  ;;  %2195 = vmatprep.subr.bf16.mxu1 %v2298_v8 }
  0x8c   : > { %2122 = vmatpush3.bf16.msra.mxu0 %v2298_v8  ;;  %2203 = vmatpush3.bf16.msra.mxu1 %v2298_v8 }
  0x8d   : > { %2123 = vmatprep.subr.bf16.mxu0 %v2299_v9  ;;  %2196 = vmatprep.subr.bf16.mxu1 %v2299_v9 }
  0x90   : > { %2124 = vmatpush3.bf16.msra.mxu0 %v2299_v9  ;;  %2204 = vmatpush3.bf16.msra.mxu1 %v2299_v9 }
  0x93   : > { %2126 = vmatmul.mubr.bf16.vlgmr.msra.gmra.mrb[0].mxu0 %v2302_v10  ;;  %2158 = vmatmul.mubr.bf16.vlgmr.msra.gmra.mrb[0].mxu1 %v2303_v11 }
  0x94   : > { %2129 = vmatprep.mubr.bf16.mxu0 %v2304_v12  ;;  %2161 = vmatprep.mubr.bf16.mxu1 %v2305_v13 }
  0x9b   : > { %2130 = vmatmul.mubr.bf16.gmra.mrb[4].mxu0 %v2306_v14  ;;  %2162 = vmatmul.mubr.bf16.gmra.mrb[4].mxu1 %v2307_v15 }
  0x9c   : > { %2133 = vmatprep.mubr.bf16.mxu0 %v2308_v16  ;;  %2165 = vmatprep.mubr.bf16.mxu1 %v2309_v17 }
  0xa3   : > { %2134 = vmatmul.mubr.bf16.gmra.mrb[8].mxu0 %v2310_v18  ;;  %2166 = vmatmul.mubr.bf16.gmra.mrb[8].mxu1 %v2311_v19 }
  0xa4   : > { %2137 = vmatprep.mubr.bf16.mxu0 %v2312_v20  ;;  %2169 = vmatprep.mubr.bf16.mxu1 %v2313_v21 }
  0xab   : > { %2138 = vmatmul.mubr.bf16.gmra.mrb[12].mxu0 %v2314_v22  ;;  %2170 = vmatmul.mubr.bf16.gmra.mrb[12].mxu1 %v2315_v23 }
  0xac   : > { %2141 = vmatprep.mubr.bf16.mxu0 %v2316_v24  ;;  %2173 = vmatprep.mubr.bf16.mxu1 %v2317_v25 }
  0xb3   : > { %2142 = vmatmul.mubr.bf16.gmra.mrb[16].mxu0 %v2318_v26  ;;  %2174 = vmatmul.mubr.bf16.gmra.mrb[16].mxu1 %v2319_v27 }
  0xb4   : > { %2145 = vmatprep.mubr.bf16.mxu0 %v2320_v28  ;;  %2177 = vmatprep.mubr.bf16.mxu1 %v2321_v29 }
  0xbb   : > { %2146 = vmatmul.mubr.bf16.gmra.mrb[20].mxu0 %v2322_v30  ;;  %2178 = vmatmul.mubr.bf16.gmra.mrb[20].mxu1 %v2323_v31 }
  0xbc   : > { %2149 = vmatprep.mubr.bf16.mxu0 %v2324_v32  ;;  %2181 = vmatprep.mubr.bf16.mxu1 %v2325_v33 }
  0xc3   : > { %2150 = vmatmul.mubr.bf16.gmra.mrb[24].mxu0 %v2326_v34  ;;  %2182 = vmatmul.mubr.bf16.gmra.mrb[24].mxu1 %v2327_v35 }
  0xc4   : > { %2153 = vmatprep.mubr.bf16.mxu0 %v2328_v36  ;;  %2185 = vmatprep.mubr.bf16.mxu1 %v2329_v37 }
  0xcb   : > { %2154 = vmatmul.mubr.bf16.gmra.mrb[28].mxu0 %v2330_v38  ;;  %2186 = vmatmul.mubr.bf16.gmra.mrb[28].mxu1 %v2331_v39 }
 0x166   : > { %v2127_v41 = vpop.f32.mrb[0].mxu0  ;;  %v2159_v42 = vpop.f32.mrb[0].mxu1 }
 0x167   : > { %v3029_v43 = vadd.f32 %v2127_v41, %v3026_v40  ;;  %v3032_v44 = vadd.f32 %v2159_v42, %v3026_v40  ;;  %v608_v45 = vpop.f32.mrb[1].mxu0  ;;  %v736_v46 = vpop.f32.mrb[1].mxu1 }
 0x168   : > { %v3035_v47 = vadd.f32 %v3026_v40, %v608_v45  ;;  %v3038_v48 = vadd.f32 %v3026_v40, %v736_v46  ;;  %v2128_v49 = vpop.f32.mrb[2].mxu0  ;;  %v2160_v50 = vpop.f32.mrb[2].mxu1 }
 0x169   : > { %v865_v51 = vsub.f32 0.0, %v3029_v43  ;;  %v897_v52 = vsub.f32 0.0, %v3032_v44  ;;  %v3043_v53 = vadd.f32 %v2128_v49, %v3026_v40  ;;  %v3046_v54 = vadd.f32 %v2160_v50, %v3026_v40  ;;  %v611_v55 = vpop.f32.mrb[3].mxu0  ;;  %v739_v56 = vpop.f32.mrb[3].mxu1 }
 0x16a   : > { %v863_v57 = vsub.f32 0.0, %v3035_v47  ;;  %v895_v58 = vsub.f32 0.0, %v3038_v48  ;;  %v3051_v59 = vadd.f32 %v3026_v40, %v611_v55  ;;  %v3054_v60 = vadd.f32 %v3026_v40, %v739_v56 }
 0x16b   : > { %v931_v61 = vmul.f32 1.442695, %v865_v51  ;;  %v995_v62 = vmul.f32 1.442695, %v897_v52  ;;  %v866_v63 = vsub.f32 0.0, %v3043_v53  ;;  %v898_v0 = vsub.f32 0.0, %v3046_v54 }
 0x16c   : > { %v927_v1 = vmul.f32 1.442695, %v863_v57  ;;  %v991_v2 = vmul.f32 1.442695, %v895_v58  ;;  %v864_v3 = vsub.f32 0.0, %v3051_v59  ;;  %v896_v4 = vsub.f32 0.0, %v3054_v60 }
 0x16d   : > { %2332 = vpow2.f32 %v931_v61  ;;  %v933_v5 = vmul.f32 1.442695, %v866_v63  ;;  %v997_v6 = vmul.f32 1.442695, %v898_v0 }
 0x16e   : > { %2334 = vpow2.f32 %v995_v62  ;;  %v2131_v7 = vpop.f32.mrb[4].mxu0  ;;  %v2163_v8 = vpop.f32.mrb[4].mxu1  ;;  %v929_v9 = vmul.f32 1.442695, %v864_v3  ;;  %v993_v14 = vmul.f32 1.442695, %v896_v4 }
 0x16f   : > { %2336 = vpow2.f32 %v927_v1  ;;  %v3061_v10 = vadd.f32 %v2131_v7, %v3026_v40  ;;  %v3064_v11 = vadd.f32 %v2163_v8, %v3026_v40  ;;  %v624_v12 = vpop.f32.mrb[5].mxu0  ;;  %v752_v13 = vpop.f32.mrb[5].mxu1 }
 0x170   : > { %2338 = vpow2.f32 %v991_v2  ;;  %v3067_v15 = vadd.f32 %v3026_v40, %v624_v12  ;;  %v3070_v16 = vadd.f32 %v3026_v40, %v752_v13  ;;  %v2132_v17 = vpop.f32.mrb[6].mxu0  ;;  %v2164_v18 = vpop.f32.mrb[6].mxu1 }
 0x171   : > { %2340 = vpow2.f32 %v933_v5  ;;  %v869_v19 = vsub.f32 0.0, %v3061_v10  ;;  %v901_v20 = vsub.f32 0.0, %v3064_v11  ;;  %v3075_v21 = vadd.f32 %v2132_v17, %v3026_v40  ;;  %v627_v22 = vpop.f32.mrb[7].mxu0  ;;  %v755_v23 = vpop.f32.mrb[7].mxu1 }
 0x172   : > { %2342 = vpow2.f32 %v997_v6  ;;  %v867_v24 = vsub.f32 0.0, %v3067_v15  ;;  %v899_v25 = vsub.f32 0.0, %v3070_v16  ;;  %v3080_v26 = vadd.f32 %v2164_v18, %v3026_v40 }
 0x173   : > { %2344 = vpow2.f32 %v929_v9  ;;  %v939_v27 = vmul.f32 1.442695, %v869_v19  ;;  %v1003_v28 = vmul.f32 1.442695, %v901_v20  ;;  %v870_v29 = vsub.f32 0.0, %v3075_v21 }
 0x174   : > { %2346 = vpow2.f32 %v993_v14  ;;  %v935_v30 = vmul.f32 1.442695, %v867_v24  ;;  %v999_v31 = vmul.f32 1.442695, %v899_v25  ;;  %v3084_v33 = vadd.f32 %v3026_v40, %v627_v22 }
 0x175   : > { %2348 = vpow2.f32 %v939_v27  ;;  %v941_v32 = vmul.f32 1.442695, %v870_v29  ;;  %v902_v37 = vsub.f32 0.0, %v3080_v26  ;;  %v3088_v45 = vadd.f32 %v3026_v40, %v755_v23 }
 0x176   : > { %2350 = vpow2.f32 %v1003_v28  ;;  %v2135_v34 = vpop.f32.mrb[8].mxu0  ;;  %v2167_v35 = vpop.f32.mrb[8].mxu1  ;;  %v868_v57 = vsub.f32 0.0, %v3084_v33 }
 0x177   : > { %v2333_v36 = vpop.eup %2332  ;;  %2352 = vpow2.f32 %v935_v30  ;;  %v640_v38 = vpop.f32.mrb[9].mxu0  ;;  %v3091_v63 = vmul.f32 1.442695, %v902_v37  ;;  %v900_v2 = vsub.f32 0.0, %v3088_v45  ;;  %v3095_v3 = vadd.f32 %v2135_v34, %v3026_v40 }
 0x178   : > { %v768_v39 = vpop.f32.mrb[9].mxu1  ;;  %v2335_v41 = vpop.eup %2334  ;;  %v1057_v42 = vadd.f32 1.0, %v2333_v36  ;;  %2354 = vpow2.f32 %v999_v31  ;;  %v3098_v6 = vadd.f32 %v2167_v35, %v3026_v40  ;;  %v3101_v7 = vadd.f32 %v3026_v40, %v640_v38 }
 0x179   : > { %v2136_v46 = vpop.f32.mrb[10].mxu0  ;;  %v2168_v49 = vpop.f32.mrb[10].mxu1  ;;  %v1089_v51 = vadd.f32 1.0, %v2335_v41  ;;  %2356 = vpow2.f32 %v941_v32  ;;  %v937_v12 = vmul.f32 1.442695, %v868_v57  ;;  %v3104_v13 = vadd.f32 %v3026_v40, %v768_v39 }
 0x17a   : > { %v2337_v50 = vpop.eup %2336  ;;  %v643_v52 = vpop.f32.mrb[11].mxu0  ;;  %2358 = vrcp.f32 %v1057_v42  ;;  %v3107_v20 = vadd.f32 %v2136_v46, %v3026_v40  ;;  %v3110_v22 = vadd.f32 %v2168_v49, %v3026_v40  ;;  %v873_v28 = vsub.f32 0.0, %v3095_v3 }
 0x17b   : > { %v2339_v55 = vpop.eup %2338  ;;  %v1055_v56 = vadd.f32 1.0, %v2337_v50  ;;  %v771_v58 = vpop.f32.mrb[11].mxu1  ;;  %2360 = vrcp.f32 %v1089_v51  ;;  %v3116_v29 = vadd.f32 %v3026_v40, %v643_v52  ;;  %v905_v35 = vsub.f32 0.0, %v3098_v6 }
 0x17c   : > { %v2341_v61 = vpop.eup %2340  ;;  %v1087_v62 = vadd.f32 1.0, %v2339_v55  ;;  %v871_v36 = vsub.f32 0.0, %v3101_v7  ;;  %v1001_v42 = vmul.f32 1.442695, %v900_v2  ;;  %v903_v46 = vsub.f32 0.0, %v3104_v13 }
 0x17d   : > { %v2343_v0 = vpop.eup %2342  ;;  %2362 = vrcp.f32 %v1055_v56  ;;  %v1058_v1 = vadd.f32 1.0, %v2341_v61  ;;  %v874_v51 = vsub.f32 0.0, %v3107_v20  ;;  %v906_v52 = vsub.f32 0.0, %v3110_v22 }
 0x17e   : > { %v2345_v4 = vpop.eup %2344  ;;  %2364 = vrcp.f32 %v1087_v62  ;;  %v1090_v5 = vadd.f32 1.0, %v2343_v0  ;;  %v2139_v14 = vpop.f32.mrb[12].mxu0  ;;  %v872_v57 = vsub.f32 0.0, %v3116_v29  ;;  %v3133_v61 = vadd.f32 %v3026_v40, %v771_v58 }
 0x17f   : > { %v2347_v8 = vpop.eup %2346  ;;  %2366 = vrcp.f32 %v1058_v1  ;;  %v1056_v9 = vadd.f32 1.0, %v2345_v4  ;;  %v2171_v17 = vpop.f32.mrb[12].mxu1  ;;  %v947_v0 = vmul.f32 1.442695, %v873_v28  ;;  %v1011_v1 = vmul.f32 1.442695, %v905_v35 }
 0x180   : > { %v2349_v18 = vpop.eup %2348  ;;  %2368 = vrcp.f32 %v1090_v5  ;;  %v1088_v19 = vadd.f32 1.0, %v2347_v8  ;;  %v656_v23 = vpop.f32.mrb[13].mxu0  ;;  %v943_v2 = vmul.f32 1.442695, %v871_v36  ;;  %v1007_v5 = vmul.f32 1.442695, %v903_v46 }
 0x181   : > { %v3112_v24 = vpop.f32.mrb[13].mxu1  ;;  %v2351_v25 = vpop.eup %2350  ;;  %2370 = vrcp.f32 %v1056_v9  ;;  %v1061_v27 = vadd.f32 1.0, %v2349_v18  ;;  %v3136_v8 = vadd.f32 %v2139_v14, %v3026_v40  ;;  %v3139_v9 = vadd.f32 %v2171_v17, %v3026_v40 }
 0x182   : > { %v3118_v30 = vpop.f32.mrb[14].mxu0  ;;  %v3120_v31 = vpop.f32.mrb[14].mxu1  ;;  %2372 = vrcp.f32 %v1088_v19  ;;  %v1093_v34 = vadd.f32 1.0, %v2351_v25  ;;  %v949_v25 = vmul.f32 1.442695, %v874_v51  ;;  %v904_v17 = vsub.f32 0.0, %v3133_v61 }
 0x183   : > { %v2353_v32 = vpop.eup %2352  ;;  %v3124_v37 = vpop.f32.mrb[15].mxu0  ;;  %2374 = vrcp.f32 %v1061_v27  ;;  %v1013_v27 = vmul.f32 1.442695, %v906_v52  ;;  %v945_v35 = vmul.f32 1.442695, %v872_v57  ;;  %v877_v52 = vsub.f32 0.0, %v3136_v8 }
 0x184   : > { %v3126_v38 = vpop.f32.mrb[15].mxu1  ;;  %v2355_v39 = vpop.eup %2354  ;;  %v1059_v41 = vadd.f32 1.0, %v2353_v32  ;;  %2376 = vrcp.f32 %v1093_v34 }
 0x185   : > { %v2357_v49 = vpop.eup %2356  ;;  %v1091_v50 = vadd.f32 1.0, %v2355_v39 }
 0x186   : > { %v2359_v55 = vpop.eup %2358  ;;  %2378 = vrcp.f32 %v1059_v41  ;;  %v1062_v56 = vadd.f32 1.0, %v2357_v49  ;;  %v3141_v18 = vpop.f32.mrb[16].mxu0  ;;  %v3159_v49 = vadd.f32 %v3026_v40, %v656_v23 }
 0x187   : > { %v2361_v62 = vpop.eup %2360  ;;  %2380 = vrcp.f32 %v1091_v50  ;;  %v3143_v19 = vpop.f32.mrb[16].mxu1  ;;  %v1124_v14 = vmul.f32 %v2359_v55, %v3029_v43  ;;  %v909_v55 = vsub.f32 0.0, %v3139_v9 }
 0x188   : > { %v2363_v4 = vpop.eup %2362  ;;  %2382 = vrcp.f32 %v1062_v56  ;;  %v3146_v28 = vpop.f32.mrb[17].mxu0 }
 0x189   : > { %v2365_v58 = vpop.eup %2364  ;;  %2384 = vpow2.f32 %v3091_v63  ;;  %v3148_v32 = vpop.f32.mrb[17].mxu1  ;;  %v1188_v63 = vmul.f32 %v2361_v62, %v3032_v44 }
 0x18a   : > { %v2367_v34 = vpop.eup %2366  ;;  %2386 = vpow2.f32 %v937_v12  ;;  %v3152_v36 = vpop.f32.mrb[18].mxu0  ;;  %v1184_v57 = vmul.f32 %v2365_v58, %v3038_v48  ;;  %v955_v48 = vmul.f32 1.442695, %v877_v52  ;;  %v3207_v52 = vadd.f32 %v3120_v31, %v3026_v40 }
 0x18b   : > { %v3154_v39 = vpop.f32.mrb[18].mxu1  ;;  %v2369_v41 = vpop.eup %2368  ;;  %v1126_v46 = vmul.f32 %v2367_v34, %v3043_v53  ;;  %2388 = vpow2.f32 %v1001_v42  ;;  %v1120_v53 = vmul.f32 %v2363_v4, %v3035_v47 }
 0x18c   : > { %v3161_v50 = vpop.f32.mrb[19].mxu0  ;;  %v3163_v43 = vpop.f32.mrb[19].mxu1  ;;  %v1190_v51 = vmul.f32 %v2369_v41, %v3046_v54  ;;  %2390 = vpow2.f32 %v947_v0  ;;  %v1009_v0 = vmul.f32 1.442695, %v904_v17 }
 0x18d   : > { %v2371_v12 = vpop.eup %2370  ;;  %v1886_v42 = vpack.c.bf16 %v1126_v46, %v1124_v14  ;;  %2392 = vpow2.f32 %v1011_v1 }
 0x18e   : > { %v2373_v44 = vpop.eup %2372  ;;  %v1122_v23 = vmul.f32 %v2371_v12, %v3051_v59  ;;  %v1966_v62 = vpack.c.bf16 %v1190_v51, %v1188_v63  ;;  %2394 = vpow2.f32 %v943_v2  ;;  %v3182_v2 = vpop.f32.mrb[20].mxu0 }
 0x18f   : > { %v2375_v56 = vpop.eup %2374  ;;  %v1186_v34 = vmul.f32 %v2373_v44, %v3054_v60  ;;  %2038 = vst [vmem:[%s3174_s20 + $0x8] sm:$0xff] %v1886_v42   ;;  %2396 = vpow2.f32 %v1007_v5  ;;  %v3180_v60 = vadd.f32 %v3026_v40, %v3112_v24  ;;  %v3184_v4 = vpop.f32.mrb[20].mxu1  ;;  %v1019_v5 = vmul.f32 1.442695, %v909_v55 }
 0x190   : > { %v2377_v54 = vpop.eup %2376  ;;  %v1881_v47 = vpack.c.bf16 %v1122_v23, %v1120_v53  ;;  %2054 = vst [vmem:[%s3174_s20 + $0x88] sm:$0xff] %v1966_v62   ;;  %2398 = vpow2.f32 %v949_v25  ;;  %v3189_v14 = vpop.f32.mrb[21].mxu0  ;;  %v875_v25 = vsub.f32 0.0, %v3159_v49  ;;  %v3197_v24 = vadd.f32 %v3118_v30, %v3026_v40 }
 0x191   : > { %v2379_v59 = vpop.eup %2378  ;;  %v1961_v1 = vpack.c.bf16 %v1186_v34, %v1184_v57  ;;  %2400 = vpow2.f32 %v1013_v27  ;;  %v3191_v17 = vpop.f32.mrb[21].mxu1  ;;  %v1132_v27 = vmul.f32 %v2375_v56, %v3061_v10  ;;  %v907_v53 = vsub.f32 0.0, %v3180_v60 }
 0x192   : > { %v3186_v58 = vpop.eup %2380  ;;  %1882 = vst [vmem:[%s3174_s20] sm:$0xff] %v1881_v47   ;;  %2402 = vpow2.f32 %v945_v35  ;;  %v3199_v63 = vpop.f32.mrb[22].mxu0  ;;  %v878_v31 = vsub.f32 0.0, %v3197_v24  ;;  %v3216_v34 = vmul.f32 1.442695, %v875_v25  ;;  %v910_v47 = vsub.f32 0.0, %v3207_v52 }
 0x193   : > { %v2383_v41 = vpop.eup %2382  ;;  %2053 = vst [vmem:[%s3174_s20 + $0x80] sm:$0xff] %v1961_v1   ;;  %v3201_v46 = vpop.f32.mrb[22].mxu1  ;;  %2404 = vpow2.f32 %v1009_v0 }
 0x194   : > { %v2385_v12 = vpop.eup %2384  ;;  %v1134_v51 = vmul.f32 %v2383_v41, %v3075_v21  ;;  %v3209_v35 = vpop.f32.mrb[23].mxu0  ;;  %2406 = vpow2.f32 %v955_v48  ;;  %v3219_v48 = vmul.f32 1.442695, %v907_v53 }
 0x195   : > { %v3211_v55 = vpop.f32.mrb[23].mxu1  ;;  %v2387_v30 = vpop.eup %2386  ;;  %v1094_v44 = vadd.f32 1.0, %v2385_v12  ;;  %2408 = vpow2.f32 %v1019_v5  ;;  %v3223_v5 = vadd.f32 %v3026_v40, %v3124_v37 }
 0x196   : > { %v2389_v42 = vpop.eup %2388  ;;  %v1896_v23 = vpack.c.bf16 %v1134_v51, %v1132_v27  ;;  %v1060_v10 = vadd.f32 1.0, %v2387_v30  ;;  %v3225_v41 = vpop.f32.mrb[24].mxu0  ;;  %v3230_v51 = vmul.f32 %v2377_v54, %v3064_v11  ;;  %v3234_v30 = vadd.f32 %v3026_v40, %v3126_v38 }
 0x197   : > { %v2391_v21 = vpop.eup %2390  ;;  %2410 = vrcp.f32 %v1094_v44  ;;  %v1092_v56 = vadd.f32 1.0, %v2389_v42  ;;  %v3227_v12 = vpop.f32.mrb[24].mxu1  ;;  %v3241_v42 = vmul.f32 %v2379_v59, %v3067_v15 }
 0x198   : > { %v2393_v57 = vpop.eup %2392  ;;  %2040 = vst [vmem:[%s3174_s20 + $0x18] sm:$0xff] %v1896_v23   ;;  %2412 = vrcp.f32 %v1060_v10  ;;  %v1065_v62 = vadd.f32 1.0, %v2391_v21  ;;  %v3236_v44 = vpop.f32.mrb[25].mxu0  ;;  %v3243_v10 = vmul.f32 1.442695, %v878_v31  ;;  %v3261_v31 = vmul.f32 %v3186_v58, %v3070_v16 }
 0x199   : > { %v2395_v0 = vpop.eup %2394  ;;  %2414 = vrcp.f32 %v1092_v56  ;;  %v1097_v1 = vadd.f32 1.0, %v2393_v57  ;;  %v3238_v53 = vpop.f32.mrb[25].mxu1  ;;  %v3249_v56 = vmul.f32 1.442695, %v910_v47  ;;  %v3253_v57 = vadd.f32 %v3141_v18, %v3026_v40 }
 0x19a   : > { %v2397_v27 = vpop.eup %2396  ;;  %2416 = vrcp.f32 %v1065_v62  ;;  %v1063_v25 = vadd.f32 1.0, %v2395_v0  ;;  %v3245_v11 = vpop.f32.mrb[26].mxu0  ;;  %v3267_v18 = vadd.f32 %v3143_v19, %v3026_v40  ;;  %v3271_v16 = vadd.f32 %v3026_v40, %v3146_v28 }
 0x19b   : > { %v2399_v37 = vpop.eup %2398  ;;  %2418 = vrcp.f32 %v1097_v1  ;;  %v1095_v23 = vadd.f32 1.0, %v2397_v27  ;;  %v3247_v54 = vpop.f32.mrb[26].mxu1  ;;  %3598 = vst [vmem:[#allocation12_spill] sm:$0xff] %v3253_v57  ;;  %v876_v1 = vsub.f32 0.0, %v3223_v5  ;;  %v3275_v58 = vadd.f32 %v3026_v40, %v3148_v32 }
 0x19c   : > { %v2401_v21 = vpop.eup %2400  ;;  %2420 = vrcp.f32 %v1063_v25  ;;  %v1066_v38 = vadd.f32 1.0, %v2399_v37  ;;  %v3255_v62 = vpop.f32.mrb[27].mxu0  ;;  %v908_v25 = vsub.f32 0.0, %v3234_v30  ;;  %v3280_v19 = vadd.f32 %v3152_v36, %v3026_v40 }
 0x19d   : > { %3599 = vst [vmem:[#allocation13_spill] sm:$0xff] %v3255_v62  ;;  %v3257_v15 = vpop.f32.mrb[27].mxu1  ;;  %v2403_v59 = vpop.eup %2402  ;;  %2422 = vrcp.f32 %v1095_v23  ;;  %v1098_v0 = vadd.f32 1.0, %v2401_v21  ;;  %3601 = vst [vmem:[#allocation15_spill] sm:$0xff] %v3275_v58  ;;  %v3284_v28 = vadd.f32 %v3154_v39, %v3026_v40  ;;  %v3294_v36 = vadd.f32 %v3026_v40, %v3161_v50 }
 0x19e   : > { %3600 = vst [vmem:[#allocation14_spill] sm:$0xff] %v3257_v15  ;;  %v2405_v27 = vpop.eup %2404  ;;  %2424 = vrcp.f32 %v1066_v38  ;;  %v1064_v47 = vadd.f32 1.0, %v2403_v59  ;;  %v881_v38 = vsub.f32 0.0, %v3253_v57  ;;  %v3286_v62 = vpop.f32.mrb[28].mxu0  ;;  %v913_v57 = vsub.f32 0.0, %v3267_v18 }
 0x19f   : > { %v2407_v37 = vpop.eup %2406  ;;  %2426 = vrcp.f32 %v1098_v0  ;;  %v1096_v15 = vadd.f32 1.0, %v2405_v27  ;;  %v953_v27 = vmul.f32 1.442695, %v876_v1  ;;  %3602 = vst [vmem:[#allocation16_spill] sm:$0xff] %v3286_v62  ;;  %v3288_v32 = vpop.f32.mrb[28].mxu1  ;;  %v911_v62 = vsub.f32 0.0, %v3275_v58 }
 0x1a0   : > { %v2409_v23 = vpop.eup %2408  ;;  %2428 = vrcp.f32 %v1064_v47  ;;  %v1069_v21 = vadd.f32 1.0, %v2407_v37  ;;  %3603 = vst [vmem:[#allocation17_spill] sm:$0xff] %v3288_v32  ;;  %v3298_v1 = vpop.f32.mrb[29].mxu1  ;;  %v879_v32 = vsub.f32 0.0, %v3271_v16 }
 0x1a1   : > { %v2411_v59 = vpop.eup %2410  ;;  %2430 = vrcp.f32 %v1096_v15  ;;  %v1101_v0 = vadd.f32 1.0, %v2409_v23  ;;  %v3296_v15 = vpop.f32.mrb[29].mxu0  ;;  %3605 = vst [vmem:[#allocation19_spill] sm:$0xff] %v3298_v1 }
 0x1a2   : > { %v2413_v47 = vpop.eup %2412  ;;  %v1198_v37 = vmul.f32 %v2411_v59, %v3080_v26  ;;  %2432 = vrcp.f32 %v1069_v21  ;;  %3604 = vst [vmem:[#allocation18_spill] sm:$0xff] %v3296_v15  ;;  %v3303_v26 = vpop.f32.mrb[30].mxu0 }
 0x1a3   : > { %v2415_v39 = vpop.eup %2414  ;;  %v1130_v23 = vmul.f32 %v2413_v47, %v3084_v33  ;;  %2434 = vrcp.f32 %v1101_v0  ;;  %3606 = vst [vmem:[#allocation20_spill] sm:$0xff] %v3303_v26  ;;  %v3305_v21 = vpop.f32.mrb[30].mxu1  ;;  %v882_v33 = vsub.f32 0.0, %v3280_v19 }
 0x1a4   : > { %3607 = vst [vmem:[#allocation21_spill] sm:$0xff] %v3305_v21  ;;  %v2417_v59 = vpop.eup %2416  ;;  %v1976_v50 = vpack.c.bf16 %v1198_v37, %v3230_v51  ;;  %v1194_v15 = vmul.f32 %v2415_v39, %v3088_v45  ;;  %2436 = vpow2.f32 %v3216_v34  ;;  %v3311_v0 = vpop.f32.mrb[31].mxu0  ;;  %v1017_v21 = vmul.f32 1.442695, %v908_v25 }
 0x1a5   : > { %3608 = vst [vmem:[#allocation22_spill] sm:$0xff] %v3311_v0  ;;  %v3313_v47 = vpop.f32.mrb[31].mxu1  ;;  %v2419_v58 = vpop.eup %2418  ;;  %v1891_v26 = vpack.c.bf16 %v1130_v23, %v3241_v42  ;;  %2438 = vpow2.f32 %v3219_v48  ;;  %v914_v51 = vsub.f32 0.0, %v3284_v28  ;;  %v963_v34 = vmul.f32 1.442695, %v881_v38 }
 0x1a6   : > { %3609 = vst [vmem:[#allocation23_spill] sm:$0xff] %v3313_v47  ;;  %v2421_v37 = vpop.eup %2420  ;;  %2056 = vst [vmem:[%s3174_s20 + $0x98] sm:$0xff] %v1976_v50   ;;  %v1971_v45 = vpack.c.bf16 %v1194_v15, %v3261_v31  ;;  %2440 = vpow2.f32 %v3243_v10  ;;  %v880_v39 = vsub.f32 0.0, %v3294_v36  ;;  %v1027_v47 = vmul.f32 1.442695, %v913_v57 }
 0x1a7   : > { %v2423_v0 = vpop.eup %2422  ;;  %2039 = vst [vmem:[%s3174_s20 + $0x10] sm:$0xff] %v1891_v26   ;;  %2442 = vpow2.f32 %v3249_v56  ;;  %v959_v48 = vmul.f32 1.442695, %v879_v32  ;;  %v1023_v25 = vmul.f32 1.442695, %v911_v62  ;;  %v1140_v50 = vmul.f32 %v2417_v59, %v3095_v3 }
 0x1a8   : > { %v2425_v42 = vpop.eup %2424  ;;  %2055 = vst [vmem:[%s3174_s20 + $0x90] sm:$0xff] %v1971_v45   ;;  %2444 = vpow2.f32 %v953_v27  ;;  %v965_v23 = vmul.f32 1.442695, %v882_v33  ;;  %v1029_v10 = vmul.f32 1.442695, %v914_v51  ;;  %v1204_v15 = vmul.f32 %v2419_v58, %v3098_v6 }
 0x1a9   : > { %v2427_v1 = vpop.eup %2426  ;;  %v1142_v31 = vmul.f32 %v2425_v42, %v3107_v20  ;;  %2446 = vpow2.f32 %v1017_v21  ;;  %v961_v57 = vmul.f32 1.442695, %v880_v39  ;;  %v1136_v27 = vmul.f32 %v2421_v37, %v3101_v7 }
 0x1aa   : > { %v2429_v38 = vpop.eup %2428  ;;  %v1206_v56 = vmul.f32 %v2427_v1, %v3110_v22  ;;  %2448 = vpow2.f32 %v963_v34  ;;  %v1200_v20 = vmul.f32 %v2423_v0, %v3104_v13  ;;  %v3340_v7 = vadd.f32 %v3026_v40, %v3163_v43 }
 0x1ab   : > { %v2431_v26 = vpop.eup %2430  ;;  %v1906_v62 = vpack.c.bf16 %v1142_v31, %v1140_v50  ;;  %v1138_v32 = vmul.f32 %v2429_v38, %v3116_v29  ;;  %2450 = vpow2.f32 %v1027_v47  ;;  %v3344_v29 = vadd.f32 %v3182_v2, %v3026_v40 }
 0x1ac   : > { %v3331_v3 = vpop.eup %2432  ;;  %v1986_v21 = vpack.c.bf16 %v1206_v56, %v1204_v15  ;;  %v1202_v6 = vmul.f32 %v2431_v26, %v3133_v61  ;;  %2452 = vpow2.f32 %v959_v48  ;;  %v3350_v33 = vadd.f32 %v3184_v4, %v3026_v40 }
 0x1ad   : > { %v3335_v22 = vpop.eup %2434  ;;  %2042 = vst [vmem:[%s3174_s20 + $0x28] sm:$0xff] %v1906_v62   ;;  %v1901_v58 = vpack.c.bf16 %v1138_v32, %v1136_v27  ;;  %2454 = vpow2.f32 %v1023_v25  ;;  %v3354_v43 = vadd.f32 %v3026_v40, %v3189_v14  ;;  %v912_v37 = vsub.f32 0.0, %v3340_v7 }
 0x1ae   : > { %v2437_v1 = vpop.eup %2436  ;;  %2058 = vst [vmem:[%s3174_s20 + $0xa8] sm:$0xff] %v1986_v21   ;;  %v1981_v13 = vpack.c.bf16 %v1202_v6, %v1200_v20  ;;  %2456 = vpow2.f32 %v965_v23  ;;  %v885_v45 = vsub.f32 0.0, %v3344_v29  ;;  %v3361_v4 = vadd.f32 %v3026_v40, %v3191_v17 }
 0x1af   : > { %v2439_v61 = vpop.eup %2438  ;;  %2041 = vst [vmem:[%s3174_s20 + $0x20] sm:$0xff] %v1901_v58   ;;  %v1067_v59 = vadd.f32 1.0, %v2437_v1  ;;  %2458 = vpow2.f32 %v1029_v10  ;;  %v917_v48 = vsub.f32 0.0, %v3350_v33  ;;  %v883_v25 = vsub.f32 0.0, %v3354_v43 }
 0x1b0   : > { %v2441_v0 = vpop.eup %2440  ;;  %2057 = vst [vmem:[%s3174_s20 + $0xa0] sm:$0xff] %v1981_v13   ;;  %v1099_v2 = vadd.f32 1.0, %v2439_v61  ;;  %2460 = vpow2.f32 %v961_v57  ;;  %v3367_v31 = vadd.f32 %v3199_v63, %v3026_v40  ;;  %v3371_v10 = vadd.f32 %v3201_v46, %v3026_v40 }
 0x1b1   : > { %v2443_v47 = vpop.eup %2442  ;;  %2462 = vrcp.f32 %v1067_v59  ;;  %v1070_v51 = vadd.f32 1.0, %v2441_v0  ;;  %v1025_v15 = vmul.f32 1.442695, %v912_v37  ;;  %v971_v56 = vmul.f32 1.442695, %v885_v45 }
 0x1b2   : > { %v2445_v34 = vpop.eup %2444  ;;  %2464 = vrcp.f32 %v1099_v2  ;;  %v1102_v39 = vadd.f32 1.0, %v2443_v47  ;;  %v915_v27 = vsub.f32 0.0, %v3361_v4  ;;  %v3376_v62 = vadd.f32 %v3026_v40, %v3209_v35 }
 0x1b3   : > { %v2447_v14 = vpop.eup %2446  ;;  %2466 = vrcp.f32 %v1070_v51  ;;  %v1068_v42 = vadd.f32 1.0, %v2445_v34  ;;  %v1035_v20 = vmul.f32 1.442695, %v917_v48  ;;  %v967_v46 = vmul.f32 1.442695, %v883_v25 }
 0x1b4   : > { %v2449_v23 = vpop.eup %2448  ;;  %2468 = vrcp.f32 %v1102_v39  ;;  %v1100_v50 = vadd.f32 1.0, %v2447_v14  ;;  %v886_v58 = vsub.f32 0.0, %v3367_v31  ;;  %v918_v1 = vsub.f32 0.0, %v3371_v10 }
 0x1b5   : > { %v2451_v17 = vpop.eup %2450  ;;  %2470 = vrcp.f32 %v1068_v42  ;;  %v1073_v38 = vadd.f32 1.0, %v2449_v23  ;;  %v3382_v59 = vadd.f32 %v3026_v40, %v3211_v55  ;;  %v3386_v35 = vadd.f32 %v3225_v41, %v3026_v40 }
 0x1b6   : > { %v2453_v57 = vpop.eup %2452  ;;  %2472 = vrcp.f32 %v1100_v50  ;;  %v1105_v26 = vadd.f32 1.0, %v2451_v17  ;;  %v1031_v47 = vmul.f32 1.442695, %v915_v27  ;;  %v884_v51 = vsub.f32 0.0, %v3376_v62 }
 0x1b7   : > { %v2455_v63 = vpop.eup %2454  ;;  %2474 = vrcp.f32 %v1073_v38  ;;  %v1071_v32 = vadd.f32 1.0, %v2453_v57  ;;  %v3391_v34 = vadd.f32 %v3227_v12, %v3026_v40  ;;  %v3395_v55 = vadd.f32 %v3026_v40, %v3236_v44 }
 0x1b8   : > { %v2457_v21 = vpop.eup %2456  ;;  %2476 = vrcp.f32 %v1105_v26  ;;  %v1103_v6 = vadd.f32 1.0, %v2455_v63  ;;  %v1148_v41 = vmul.f32 %v3331_v3, %v3136_v8  ;;  %v973_v14 = vmul.f32 1.442695, %v886_v58 }
 0x1b9   : > { %v2459_v13 = vpop.eup %2458  ;;  %2478 = vrcp.f32 %v1071_v32  ;;  %v1074_v61 = vadd.f32 1.0, %v2457_v21  ;;  %v1037_v42 = vmul.f32 1.442695, %v918_v1  ;;  %v1212_v25 = vmul.f32 %v3335_v22, %v3139_v9 }
 0x1ba   : > { %v2461_v0 = vpop.eup %2460  ;;  %2480 = vrcp.f32 %v1103_v6  ;;  %v1106_v2 = vadd.f32 1.0, %v2459_v13  ;;  %v916_v23 = vsub.f32 0.0, %v3382_v59  ;;  %v889_v12 = vsub.f32 0.0, %v3386_v35 }
 0x1bb   : > { %v2463_v37 = vpop.eup %2462  ;;  %2482 = vrcp.f32 %v1074_v61  ;;  %v1072_v45 = vadd.f32 1.0, %v2461_v0  ;;  %v969_v17 = vmul.f32 1.442695, %v884_v51  ;;  %v3406_v8 = vadd.f32 %v3026_v40, %v3238_v53  ;;  %v3610_v0 = vld [vmem:[#allocation12_spill] sm:$0xff] }
 0x1bc   : > { %v2465_v39 = vpop.eup %2464  ;;  %2484 = vrcp.f32 %v1106_v2  ;;  %v921_v9 = vsub.f32 0.0, %v3391_v34  ;;  %v887_v22 = vsub.f32 0.0, %v3395_v55  ;;  %v1144_v26 = vmul.f32 %v2463_v37, %v3159_v49 }
 0x1bd   : > { %v2467_v48 = vpop.eup %2466  ;;  %2486 = vrcp.f32 %v1072_v45  ;;  %v1208_v53 = vmul.f32 %v2465_v39, %v3180_v60  ;;  %v1033_v21 = vmul.f32 1.442695, %v916_v23  ;;  %v919_v49 = vsub.f32 0.0, %v3406_v8 }
 0x1be   : > { %v2469_v50 = vpop.eup %2468  ;;  %v1150_v44 = vmul.f32 %v2467_v48, %v3197_v24  ;;  %2488 = vpow2.f32 %v1025_v15  ;;  %v1043_v60 = vmul.f32 1.442695, %v921_v9  ;;  %v3424_v1 = vadd.f32 %v3245_v11, %v3026_v40 }
 0x1bf   : > { %v2471_v3 = vpop.eup %2470  ;;  %v1214_v38 = vmul.f32 %v2469_v50, %v3207_v52  ;;  %2490 = vpow2.f32 %v971_v56  ;;  %v3428_v13 = vadd.f32 %v3247_v54, %v3026_v40  ;;  %v1039_v51 = vmul.f32 1.442695, %v919_v49 }
 0x1c0   : > { %v2473_v57 = vpop.eup %2472  ;;  %v1916_v24 = vpack.c.bf16 %v1150_v44, %v1148_v41  ;;  %v1146_v15 = vmul.f32 %v2471_v3, %v3223_v5  ;;  %2492 = vpow2.f32 %v1035_v20  ;;  %v979_v20 = vmul.f32 1.442695, %v889_v12  ;;  %v2588_v44 = vld [vmem:[#allocation7] ss:$0 sm:$0xff] }
 0x1c1   : > { %v2475_v27 = vpop.eup %2474  ;;  %v1996_v63 = vpack.c.bf16 %v1214_v38, %v1212_v25  ;;  %v1210_v52 = vmul.f32 %v2473_v57, %v3234_v30  ;;  %2494 = vpow2.f32 %v967_v46  ;;  %v975_v46 = vmul.f32 1.442695, %v887_v22 }
 0x1c2   : > { %v2477_v56 = vpop.eup %2476  ;;  %2044 = vst [vmem:[%s3174_s20 + $0x38] sm:$0xff] %v1916_v24   ;;  %v1911_v32 = vpack.c.bf16 %v1146_v15, %v1144_v26  ;;  %2496 = vpow2.f32 %v1031_v47  ;;  %v1156_v2 = vmul.f32 %v2475_v27, %v3610_v0  ;;  %v890_v48 = vsub.f32 0.0, %v3424_v1 }
 0x1c3   : > { %v2479_v6 = vpop.eup %2478  ;;  %2060 = vst [vmem:[%s3174_s20 + $0xb8] sm:$0xff] %v1996_v63   ;;  %v1991_v5 = vpack.c.bf16 %v1210_v52, %v1208_v53  ;;  %2498 = vpow2.f32 %v973_v14  ;;  %v1220_v45 = vmul.f32 %v2477_v56, %v3267_v18  ;;  %v922_v23 = vsub.f32 0.0, %v3428_v13  ;;  %v3612_v53 = vld [vmem:[#allocation14_spill] sm:$0xff]  ;;  %v3613_v52 = vld [vmem:[#allocation16_spill] sm:$0xff] }
 0x1c4   : > { %v3418_v58 = vpop.eup %2480  ;;  %2043 = vst [vmem:[%s3174_s20 + $0x30] sm:$0xff] %v1911_v32   ;;  %2500 = vpow2.f32 %v1037_v42  ;;  %v1152_v41 = vmul.f32 %v2479_v6, %v3271_v16  ;;  %v981_v26 = vmul.f32 1.442695, %v890_v48  ;;  %v3445_v63 = vadd.f32 %v2588_v44, %v3612_v53  ;;  %v3614_v6 = vld [vmem:[#allocation17_spill] sm:$0xff] }
 0x1c5   : > { %v2483_v30 = vpop.eup %2482  ;;  %2059 = vst [vmem:[%s3174_s20 + $0xb0] sm:$0xff] %v1991_v5   ;;  %2502 = vpow2.f32 %v969_v17  ;;  %v3611_v17 = vld [vmem:[#allocation13_spill] sm:$0xff]  ;;  %v1045_v24 = vmul.f32 1.442695, %v922_v23  ;;  %v3448_v56 = vadd.f32 %v2588_v44, %v3613_v52  ;;  %v3452_v5 = vadd.f32 %v2588_v44, %v3614_v6  ;;  %v3620_v23 = vld [vmem:[#allocation15_spill] sm:$0xff] }
 0x1c6   : > { %v2485_v61 = vpop.eup %2484  ;;  %v1158_v47 = vmul.f32 %v2483_v30, %v3280_v19  ;;  %2504 = vpow2.f32 %v1033_v21  ;;  %v3442_v3 = vadd.f32 %v2588_v44, %v3611_v17  ;;  %v3615_v30 = vld [vmem:[#allocation18_spill] sm:$0xff] }
 0x1c7   : > { %v2487_v37 = vpop.eup %2486  ;;  %v1222_v39 = vmul.f32 %v2485_v61, %v3284_v28  ;;  %2506 = vpow2.f32 %v979_v20  ;;  %v3616_v61 = vld [vmem:[#allocation19_spill] sm:$0xff]  ;;  %v925_v48 = vsub.f32 0.0, %v3452_v5 }
 0x1c8   : > { %v2489_v11 = vpop.eup %2488  ;;  %v1926_v40 = vpack.c.bf16 %v1158_v47, %v1156_v2  ;;  %v1154_v54 = vmul.f32 %v2487_v37, %v3294_v36  ;;  %2508 = vpow2.f32 %v1043_v60  ;;  %v888_v49 = vsub.f32 0.0, %v3442_v3 }
 0x1c9   : > { %v2491_v14 = vpop.eup %2490  ;;  %v2006_v19 = vpack.c.bf16 %v1222_v39, %v1220_v45  ;;  %v1104_v42 = vadd.f32 1.0, %v2489_v11  ;;  %2510 = vpow2.f32 %v975_v46  ;;  %v3455_v46 = vadd.f32 %v2588_v44, %v3615_v30  ;;  %v3618_v45 = vld [vmem:[#allocation21_spill] sm:$0xff] }
 0x1ca   : > { %v2493_v25 = vpop.eup %2492  ;;  %2046 = vst [vmem:[%s3174_s20 + $0x48] sm:$0xff] %v1926_v40   ;;  %v1921_v18 = vpack.c.bf16 %v1154_v54, %v1152_v41  ;;  %v1077_v28 = vadd.f32 1.0, %v2491_v14  ;;  %2512 = vpow2.f32 %v1039_v51  ;;  %v3458_v0 = vadd.f32 %v2588_v44, %v3616_v61  ;;  %v3617_v51 = vld [vmem:[#allocation20_spill] sm:$0xff] }
 0x1cb   : > { %v2495_v16 = vpop.eup %2494  ;;  %2062 = vst [vmem:[%s3174_s20 + $0xc8] sm:$0xff] %v2006_v19   ;;  %2514 = vrcp.f32 %v1104_v42  ;;  %v1109_v12 = vadd.f32 1.0, %v2493_v25  ;;  %v3461_v37 = vadd.f32 %v2588_v44, %v3617_v51  ;;  %v3464_v39 = vadd.f32 %v2588_v44, %v3618_v45  ;;  %v3619_v25 = vld [vmem:[#allocation22_spill] sm:$0xff] }
 0x1cc   : > { %v2497_v36 = vpop.eup %2496  ;;  %2045 = vst [vmem:[%s3174_s20 + $0x40] sm:$0xff] %v1921_v18   ;;  %2516 = vrcp.f32 %v1077_v28  ;;  %v1075_v50 = vadd.f32 1.0, %v2495_v16  ;;  %v920_v40 = vsub.f32 0.0, %v3445_v63  ;;  %v893_v54 = vsub.f32 0.0, %v3448_v56 }
 0x1cd   : > { %v2499_v38 = vpop.eup %2498  ;;  %2518 = vrcp.f32 %v1109_v12  ;;  %v1107_v9 = vadd.f32 1.0, %v2497_v36  ;;  %v977_v42 = vmul.f32 1.442695, %v888_v49  ;;  %v3470_v18 = vadd.f32 %v2588_v44, %v3619_v25 }
 0x1ce   : > { %v2501_v22 = vpop.eup %2500  ;;  %2520 = vrcp.f32 %v1075_v50  ;;  %v1078_v57 = vadd.f32 1.0, %v2499_v38  ;;  %v1216_v16 = vmul.f32 %v3418_v58, %v3620_v23  ;;  %v891_v12 = vsub.f32 0.0, %v3455_v46 }
 0x1cf   : > { %v2503_v15 = vpop.eup %2502  ;;  %2522 = vrcp.f32 %v1107_v9  ;;  %v1110_v27 = vadd.f32 1.0, %v2501_v22  ;;  %v923_v36 = vsub.f32 0.0, %v3458_v0  ;;  %v894_v38 = vsub.f32 0.0, %v3461_v37 }
 0x1d0   : > { %v2505_v32 = vpop.eup %2504  ;;  %2524 = vrcp.f32 %v1078_v57  ;;  %v1076_v21 = vadd.f32 1.0, %v2503_v15  ;;  %v926_v9 = vsub.f32 0.0, %v3464_v39  ;;  %v1041_v57 = vmul.f32 1.442695, %v920_v40  ;;  %v3621_v15 = vld [vmem:[#allocation23_spill] sm:$0xff] }
 0x1d1   : > { %v2507_v20 = vpop.eup %2506  ;;  %2526 = vrcp.f32 %v1110_v27  ;;  %v1108_v60 = vadd.f32 1.0, %v2505_v32  ;;  %v3480_v27 = vadd.f32 %v2588_v44, %v3621_v15  ;;  %v987_v52 = vmul.f32 1.442695, %v893_v54 }
 0x1d2   : > { %v2509_v2 = vpop.eup %2508  ;;  %2528 = vrcp.f32 %v1076_v21  ;;  %v1081_v47 = vadd.f32 1.0, %v2507_v20  ;;  %v892_v32 = vsub.f32 0.0, %v3470_v18  ;;  %v983_v49 = vmul.f32 1.442695, %v891_v12 }
 0x1d3   : > { %v2511_v11 = vpop.eup %2510  ;;  %2530 = vrcp.f32 %v1108_v60  ;;  %v1113_v41 = vadd.f32 1.0, %v2509_v2  ;;  %v1047_v20 = vmul.f32 1.442695, %v923_v36  ;;  %v989_v60 = vmul.f32 1.442695, %v894_v38 }
 0x1d4   : > { %v2513_v14 = vpop.eup %2512  ;;  %v1079_v19 = vadd.f32 1.0, %v2511_v11  ;;  %2532 = vrcp.f32 %v1081_v47  ;;  %v1053_v30 = vmul.f32 1.442695, %v926_v9  ;;  %v985_v45 = vmul.f32 1.442695, %v892_v32 }
 0x1d5   : > { %v2515_v28 = vpop.eup %2514  ;;  %2534 = vrcp.f32 %v1113_v41  ;;  %v1111_v25 = vadd.f32 1.0, %v2513_v14 }
 0x1d6   : > { %v2517_v50 = vpop.eup %2516  ;;  %v1218_v17 = vmul.f32 %v2515_v28, %v3340_v7  ;;  %2536 = vrcp.f32 %v1079_v19  ;;  %v1051_v7 = vmul.f32 1.442695, %v925_v48 }
 0x1d7   : > { %v2519_v22 = vpop.eup %2518  ;;  %2538 = vpow2.f32 %v981_v26  ;;  %v1164_v44 = vmul.f32 %v2517_v50, %v3344_v29  ;;  %v924_v26 = vsub.f32 0.0, %v3480_v27 }
 0x1d8   : > { %v2521_v58 = vpop.eup %2520  ;;  %v2001_v53 = vpack.c.bf16 %v1218_v17, %v1216_v16  ;;  %2540 = vpow2.f32 %v1045_v24  ;;  %v1228_v24 = vmul.f32 %v2519_v22, %v3350_v33 }
 0x1d9   : > { %v2523_v21 = vpop.eup %2522  ;;  %2542 = vpow2.f32 %v977_v42  ;;  %v1160_v41 = vmul.f32 %v2521_v58, %v3354_v43  ;;  %v1049_v42 = vmul.f32 1.442695, %v924_v26 }
 0x1da   : > { %v2525_v6 = vpop.eup %2524  ;;  %2061 = vst [vmem:[%s3174_s20 + $0xc0] sm:$0xff] %v2001_v53   ;;  %2544 = vpow2.f32 %v1041_v57 }
 0x1db   : > { %v2527_v61 = vpop.eup %2526  ;;  %v1166_v2 = vmul.f32 %v2525_v6, %v3367_v31  ;;  %2546 = vpow2.f32 %v987_v52  ;;  %v1224_v31 = vmul.f32 %v2523_v21, %v3361_v4 }
 0x1dc   : > { %v2529_v47 = vpop.eup %2528  ;;  %v1230_v51 = vmul.f32 %v2527_v61, %v3371_v10  ;;  %2548 = vpow2.f32 %v1051_v7 }
 0x1dd   : > { %v2531_v11 = vpop.eup %2530  ;;  %v1936_v40 = vpack.c.bf16 %v1166_v2, %v1164_v44  ;;  %v1162_v29 = vmul.f32 %v2529_v47, %v3376_v62  ;;  %2550 = vpow2.f32 %v983_v49 }
 0x1de   : > { %v2016_v54 = vpack.c.bf16 %v1230_v51, %v1228_v24  ;;  %v1226_v19 = vmul.f32 %v2531_v11, %v3382_v59  ;;  %v2533_v33 = vpop.eup %2532  ;;  %2552 = vpow2.f32 %v1047_v20 }
 0x1df   : > { %2048 = vst [vmem:[%s3174_s20 + $0x58] sm:$0xff] %v1936_v40   ;;  %v1931_v10 = vpack.c.bf16 %v1162_v29, %v1160_v41  ;;  %v2535_v48 = vpop.eup %2534  ;;  %2554 = vpow2.f32 %v989_v60  ;;  %v1172_v44 = vmul.f32 %v2533_v33, %v3386_v35 }
 0x1e0   : > { %2064 = vst [vmem:[%s3174_s20 + $0xd8] sm:$0xff] %v2016_v54   ;;  %v2011_v43 = vpack.c.bf16 %v1226_v19, %v1224_v31  ;;  %v2537_v62 = vpop.eup %2536  ;;  %2556 = vpow2.f32 %v1053_v30  ;;  %v1236_v47 = vmul.f32 %v2535_v48, %v3391_v34 }
 0x1e1   : > { %2047 = vst [vmem:[%s3174_s20 + $0x50] sm:$0xff] %v1931_v10   ;;  %v2539_v28 = vpop.eup %2538  ;;  %2558 = vpow2.f32 %v985_v45  ;;  %v1168_v45 = vmul.f32 %v2537_v62, %v3395_v55 }
 0x1e2   : > { %2063 = vst [vmem:[%s3174_s20 + $0xd0] sm:$0xff] %v2011_v43   ;;  %v2541_v4 = vpop.eup %2540  ;;  %v1082_v59 = vadd.f32 1.0, %v2539_v28  ;;  %2560 = vpow2.f32 %v1049_v42 }
 0x1e3   : > { %v2543_v23 = vpop.eup %2542  ;;  %2562 = vrcp.f32 %v1111_v25  ;;  %v1114_v16 = vadd.f32 1.0, %v2541_v4 }
 0x1e4   : > { %v2545_v12 = vpop.eup %2544  ;;  %2564 = vrcp.f32 %v1082_v59  ;;  %v1080_v36 = vadd.f32 1.0, %v2543_v23 }
 0x1e5   : > { %v2547_v50 = vpop.eup %2546  ;;  %2566 = vrcp.f32 %v1114_v16  ;;  %v1112_v17 = vadd.f32 1.0, %v2545_v12 }
 0x1e6   : > { %v2549_v14 = vpop.eup %2548  ;;  %2568 = vrcp.f32 %v1080_v36  ;;  %v1085_v38 = vadd.f32 1.0, %v2547_v50 }
 0x1e7   : > { %v2551_v9 = vpop.eup %2550  ;;  %2570 = vrcp.f32 %v1112_v17  ;;  %v1117_v22 = vadd.f32 1.0, %v2549_v14 }
 0x1e8   : > { %v2553_v57 = vpop.eup %2552  ;;  %2572 = vrcp.f32 %v1085_v38  ;;  %v1083_v15 = vadd.f32 1.0, %v2551_v9 }
 0x1e9   : > { %v2555_v58 = vpop.eup %2554  ;;  %2574 = vrcp.f32 %v1117_v22  ;;  %v1115_v53 = vadd.f32 1.0, %v2553_v57 }
 0x1ea   : > { %v2557_v52 = vpop.eup %2556  ;;  %2576 = vrcp.f32 %v1083_v15  ;;  %v1086_v32 = vadd.f32 1.0, %v2555_v58 }
 0x1eb   : > { %v2559_v21 = vpop.eup %2558  ;;  %2578 = vrcp.f32 %v1115_v53  ;;  %v1118_v7 = vadd.f32 1.0, %v2557_v52 }
 0x1ec   : > { %v2561_v49 = vpop.eup %2560  ;;  %2580 = vrcp.f32 %v1086_v32  ;;  %v1084_v6 = vadd.f32 1.0, %v2559_v21 }
 0x1ed   : > { %v2563_v20 = vpop.eup %2562  ;;  %2582 = vrcp.f32 %v1118_v7  ;;  %v1116_v60 = vadd.f32 1.0, %v2561_v49 }
 0x1ee   : > { %v2565_v30 = vpop.eup %2564  ;;  %2584 = vrcp.f32 %v1084_v6  ;;  %v1232_v35 = vmul.f32 %v2563_v20, %v3406_v8 }
 0x1ef   : > { %v2567_v61 = vpop.eup %2566  ;;  %v1174_v2 = vmul.f32 %v2565_v30, %v3424_v1  ;;  %2586 = vrcp.f32 %v1116_v60 }
 0x1f0   : > { %v2569_v26 = vpop.eup %2568  ;;  %v1238_v24 = vmul.f32 %v2567_v61, %v3428_v13 }
 0x1f1   : > { %v2571_v51 = vpop.eup %2570  ;;  %v1946_v11 = vpack.c.bf16 %v1174_v2, %v1172_v44  ;;  %v1170_v41 = vmul.f32 %v2569_v26, %v3442_v3 }
 0x1f2   : > { %v2573_v40 = vpop.eup %2572  ;;  %v2026_v29 = vpack.c.bf16 %v1238_v24, %v1236_v47  ;;  %v1234_v1 = vmul.f32 %v2571_v51, %v3445_v63 }
 0x1f3   : > { %v2575_v31 = vpop.eup %2574  ;;  %2050 = vst [vmem:[%s3174_s20 + $0x68] sm:$0xff] %v1946_v11   ;;  %v1941_v34 = vpack.c.bf16 %v1170_v41, %v1168_v45  ;;  %v1180_v33 = vmul.f32 %v2573_v40, %v3448_v56 }
 0x1f4   : > { %v2577_v13 = vpop.eup %2576  ;;  %2066 = vst [vmem:[%s3174_s20 + $0xe8] sm:$0xff] %v2026_v29   ;;  %v2021_v54 = vpack.c.bf16 %v1234_v1, %v1232_v35  ;;  %v1244_v63 = vmul.f32 %v2575_v31, %v3452_v5 }
 0x1f5   : > { %v2579_v19 = vpop.eup %2578  ;;  %2049 = vst [vmem:[%s3174_s20 + $0x60] sm:$0xff] %v1941_v34   ;;  %v1176_v43 = vmul.f32 %v2577_v13, %v3455_v46 }
 0x1f6   : > { %v2581_v55 = vpop.eup %2580  ;;  %2065 = vst [vmem:[%s3174_s20 + $0xe0] sm:$0xff] %v2021_v54  }
 0x1f7   : > { %v2583_v3 = vpop.eup %2582  ;;  %v1182_v8 = vmul.f32 %v2581_v55, %v3461_v37  ;;  %v1240_v37 = vmul.f32 %v2579_v19, %v3458_v0 }
 0x1f8   : > { %v2585_v10 = vpop.eup %2584  ;;  %v1246_v42 = vmul.f32 %v2583_v3, %v3464_v39 }
 0x1f9   : > { %v2587_v48 = vpop.eup %2586  ;;  %v1956_v25 = vpack.c.bf16 %v1182_v8, %v1180_v33  ;;  %v1178_v56 = vmul.f32 %v2585_v10, %v3470_v18 }
 0x1fa   : > { %v2036_v62 = vpack.c.bf16 %v1246_v42, %v1244_v63  ;;  %v1242_v28 = vmul.f32 %v2587_v48, %v3480_v27 }
 0x1fb   : > { %2052 = vst [vmem:[%s3174_s20 + $0x78] sm:$0xff] %v1956_v25   ;;  %v1951_v5 = vpack.c.bf16 %v1178_v56, %v1176_v43 }
 0x1fc   : > { %2068 = vst [vmem:[%s3174_s20 + $0xf8] sm:$0xff] %v2036_v62   ;;  %v2031_v46 = vpack.c.bf16 %v1242_v28, %v1240_v37 }
 0x1fd   : > { %2051 = vst [vmem:[%s3174_s20 + $0x70] sm:$0xff] %v1951_v5  }
 0x1fe   : > { %2067 = vst [vmem:[%s3174_s20 + $0xf0] sm:$0xff] %v2031_v46  }
 0x1ff   : > { %2688 = shalt.err (!%p2685_p5)
}
 0x200   : > { %s2689_s21 = scalar_lea.hbm %s3523_s15, 4096  ;;  %s2693_s5 = scalar_lea.hbm %s3579_s3, 16384 }
 0x201   : > { %p2690_p9 = scmp.ne.s32.totalorder %s3523_s15, %s2689_s21  ;;  %p2694_p3 = scmp.lt.u32.totalorder %s3523_s15, %s3579_s3 }
 0x202   : > { %p2695_p7 = scmp.lt.u32.totalorder %s2693_s5, %s2689_s21  ;;  %p2697_p2 = scmp.lt.u32.totalorder %s2689_s21, %s3523_s15 }
 0x203   : > { %p2691_p12 = pnand %p2690_p9, %p2920_p11 }
 0x204   : > { %p2696_p10 = por %p2695_p7, %p2694_p3 }
 0x205   : > { %p2692_p1 = pneg %p2691_p12 }
 0x206   : > { %p2698_p4 = por %p2697_p2, %p2696_p10 }
 0x208   : > { %p2699_p6 = pnand %p2698_p4, %p2692_p1 }
 0x20a   : > { %2702 = shalt.err (!%p2699_p6)
}
 0x20b   : > { %s2769_s20 = smov 64   ;;  %s2770_s22 = smov 4  }
 0x20c   : > { %2215 = dma.vmem_to_hbm [thread:$0]  (%p2920_p11), %s3525_s24, 4096, %s3523_s15, %s1568_s26, %s2769_s20, %s2769_s20, %s2770_s22  }
 0x20d PF: > { %p2237_p8 = scmp.ge.s32.totalorder %s2761_s17, 2  ;;  %s1597_s11 = sand.u32 1, %s2741_s12  }
 0x20e   : > { %p3622_p13 = scmp.ne.s32.totalorder %s3589_s23, 0  ;;  %s1598_s18 = scalar_lea.sflag [#allocation4], %s1597_s11 }
 0x210   : > { %p2229_p0 = pnand %p2237_p8, %p3622_p13 }
 0x212   : > { %2736 = dma.done.wait (!%p2229_p0), %s1598_s18, 4096  }
 0x213   : > { %2738 = vsyncadd (!%p2229_p0), %s1598_s18, 4294963200  ;;  %s20_s17 = sadd.s32 1, %s2761_s17   ;;  %s3623_s12 = smov %s2745_s13 }
 0x214   : > { %p17_p5 = scmp.ge.s32.totalorder %s20_s17, 6   ;;  %s3624_s13 = smov %s2749_s14 }
 0x215   : > { %s3625_s14 = smov %s2929_s6  ;;  %s3626_s15 = smov %s2757_s16 }
 0x216   : > { %s3627_s16 = smov %s3629_s25  ;;  %19 = sbr.rel (!%p17_p5) target bundleno = 7 (0x7), region = 87 }
 0x21d   :  { %1603 = vsyncpa [#allocation3], 1 }
 0x21e   :  { %1605 = vsyncpa [#allocation3 + $0x1], 1 }
 0x21f   :  { %1606 = vsyncpa [#allocation6], 1 }
 0x220   :  { %1607 = vsyncpa [#allocation4], 1 }
 0x221   :  { %1609 = vsyncpa [#allocation4 + $0x1], 1 }

</bundles_post_ra>
